<compile_context>
chip_gen: v7x
topology: tpu7x:2x2x1
jax: 0.10.0
libtpu: 0.0.40
codegen_flags: <defaults>
</compile_context>

<pallas_src>
import functools

import jax
import jax.numpy as jnp
from jax.experimental import pallas as pl
from jax.experimental.pallas import tpu as pltpu


def _round_up(x, m):
    return ((x + m - 1) // m) * m


def _pick_tile_rows(n, h, w, c, tile_rows=None, vmem_budget_bytes=24 << 20):
    """Pick the number of image rows per grid step.

    Largest divisor of H whose in-kernel working set fits the VMEM budget while keeping
    at least min(4, N*H) grid steps (so v7x's two TensorCores both get work at small N).
    """
    if tile_rows is not None:
        if h % tile_rows:
            raise ValueError(f"tile_rows={tile_rows} must divide H={h}")
        return tile_rows
    wr = _round_up(w, 8)          # sublane-padded width
    cb = _round_up(c, 128)        # lane-padded channels
    # Rough f32-equivalent bytes per output row: double-buffered in/out blocks (8+8),
    # bf16 body (2), f32 z (12 = 3*CB wide), acc (4), tap temporaries (~12), pre-cast out (4).
    per_row = 48 * wr * cb
    mem_rows = max(1, vmem_budget_bytes // per_row)
    target_steps = min(4, n * h)
    best = 1
    for d in range(1, h + 1):
        if h % d:
            continue
        if d <= mem_rows and n * (h // d) >= target_steps:
            best = d
    return best


def _shortcut_conv3x3_kernel(xt_ref, xm_ref, xb_ref, w_ref, b_ref, o_ref, *,
                             th, w, c, cb, nh, compute_dtype):
    # xt_ref: (1, 1, W, C)   row above the tile (index clamped at the image border)
    # xm_ref: (1, TH, W, C)  the TH rows this grid step produces
    # xb_ref: (1, 1, W, C)   row below the tile (index clamped at the image border)
    # w_ref : (3, C, 3*CB)   per-ky weights; kx taps fused on the MXU output dim, each
    #                        tap zero-padded to CB = round_up(C, 128) lanes
    # b_ref : (1, 1, C)      f32 bias
    # o_ref : (1, TH, W, C)
    t = pl.program_id(1)

    mid = xm_ref[0]                                            # (TH, W, C) original rows
    cdt = compute_dtype if compute_dtype is not None else mid.dtype

    # Cast the matmul operands once, *before* row assembly (halves assembly bytes).
    midc = mid.astype(cdt)
    topc = xt_ref[0].astype(cdt) * (t > 0).astype(cdt)         # zero above the image top
    botc = xb_ref[0].astype(cdt) * (t < nh - 1).astype(cdt)    # zero below the image bottom

    # (TH+2, W, C) working tile: a row-axis stack only (no lane relayout, no width pad).
    body = jnp.concatenate([topc, midc, botc], axis=0)

    # Column-edge masks replace the old zero width-pad: the kx=-1 tap is invalid at output
    # column 0 and the kx=+1 tap at column W-1 (this also kills the roll wrap-around).
    col = jax.lax.broadcasted_iota(jnp.int32, (1, w, 1), 1)
    not_left = (col != 0).astype(jnp.float32)
    not_right = (col != w - 1).astype(jnp.float32)

    acc = None                                                 # f32 accumulator (TH, W, CB)
    for dy in range(3):
        rows = body[dy:dy + th]                                # ky-shifted rows (row-axis slice)
        z = jnp.dot(rows.reshape(th * w, c), w_ref[dy],
                    preferred_element_type=jnp.float32)        # one fat matmul per ky
        z = z.reshape(th, w, 3 * cb)
        # kx taps: lane-group-aligned slices at 0 / CB / 2*CB (no cross-lane relayout);
        # the +-1 column shifts run on the XLU via pltpu.roll (nearly free).
        g0 = pltpu.roll(z[:, :, 0:cb], shift=1, axis=1) * not_left            # kx = -1
        g1 = z[:, :, cb:2 * cb]                                               # kx =  0
        g2 = pltpu.roll(z[:, :, 2 * cb:3 * cb], shift=w - 1, axis=1) * not_right  # kx = +1
        s = g0 + g1 + g2
        acc = s if acc is None else acc + s

    # Fused residual + bias epilogue in f32; single cast on store.
    out = acc[:, :, :c] + mid.astype(jnp.float32) + b_ref[...]
    o_ref[0] = out.astype(o_ref.dtype)


def shortcut_block_nhwc(x, weight_oihw, bias, *, tile_rows=None,
                        compute_dtype=jnp.bfloat16, vmem_budget_bytes=24 << 20):
    """out = x + conv3x3(x) + b.  x: (N, H, W, C) NHWC, weight: (Cout, Cin, 3, 3)."""
    n, h, w, c = x.shape
    assert weight_oihw.shape == (c, c, 3, 3)
    cb = _round_up(c, 128)
    th = _pick_tile_rows(n, h, w, c, tile_rows=tile_rows,
                         vmem_budget_bytes=vmem_budget_bytes)
    nh = h // th

    cdt = compute_dtype if compute_dtype is not None else x.dtype
    # (Cout, Cin, ky, kx) -> (ky, Cin, kx, Cout); zero-pad Cout to CB so each kx block of
    # the matmul output starts on a 128-lane boundary; fuse kx onto the MXU output dim.
    wt = jnp.transpose(weight_oihw, (2, 1, 3, 0))              # (ky, Cin, kx, Cout)
    wt = jnp.pad(wt, ((0, 0), (0, 0), (0, 0), (0, cb - c)))
    wf = wt.reshape(3, c, 3 * cb).astype(cdt)
    b = bias.astype(jnp.float32).reshape(1, 1, c)

    kernel = functools.partial(_shortcut_conv3x3_kernel, th=th, w=w, c=c, cb=cb, nh=nh,
                               compute_dtype=compute_dtype)

    # Explicit scoped-VMEM limit (v5e default of 16 MiB would cap tile size); capped at
    # v7x's 64 MiB physical VMEM.
    wr = _round_up(w, 8)
    wf_bytes = 3 * c * 3 * cb * jnp.dtype(cdt).itemsize
    est = th * 48 * wr * cb + wf_bytes + (2 << 20)
    vmem_limit = int(min(max(est * 3 // 2, 32 << 20), 64 << 20))

    io_bytes = 2 * n * h * w * c * x.dtype.itemsize
    cost = pl.CostEstimate(flops=int(2 * 9 * c * c * n * h * w),
                           transcendentals=0,
                           bytes_accessed=int(io_bytes + wf_bytes + c * 4))

    return pl.pallas_call(
        kernel,
        out_shape=jax.ShapeDtypeStruct((n, h, w, c), x.dtype),
        grid_spec=pltpu.PrefetchScalarGridSpec(
            num_scalar_prefetch=0,
            grid=(n, nh),
            in_specs=[
                # top halo row (element row t*TH-1, clamped; zeroed in-kernel at the border)
                pl.BlockSpec((1, 1, w, c),
                             lambda ni, ti: (ni, jnp.maximum(ti * th - 1, 0), 0, 0)),
                # the TH rows this step produces
                pl.BlockSpec((1, th, w, c), lambda ni, ti: (ni, ti, 0, 0)),
                # bottom halo row (element row (t+1)*TH, clamped; zeroed at the border)
                pl.BlockSpec((1, 1, w, c),
                             lambda ni, ti: (ni, jnp.minimum((ti + 1) * th, h - 1), 0, 0)),
                pl.BlockSpec((3, c, 3 * cb), lambda ni, ti: (0, 0, 0)),
                pl.BlockSpec((1, 1, c), lambda ni, ti: (0, 0, 0)),
            ],
            out_specs=pl.BlockSpec((1, th, w, c), lambda ni, ti: (ni, ti, 0, 0)),
        ),
        compiler_params=pltpu.CompilerParams(
            dimension_semantics=("parallel", "parallel"),
            vmem_limit_bytes=vmem_limit),
        cost_estimate=cost,
    )(x, x, x, wf, b)


def shortcut_block(x_nchw, weight_oihw, bias, **kwargs):
    """PyTorch-layout (NCHW) wrapper.  Prefer shortcut_block_nhwc in an NHWC pipeline to
    avoid the two layout transposes around the kernel."""
    x = jnp.transpose(x_nchw, (0, 2, 3, 1))
    y = shortcut_block_nhwc(x, weight_oihw, bias, **kwargs)
    return jnp.transpose(y, (0, 3, 1, 2))


def _reference_nhwc(x, weight_oihw, bias):
    w_hwio = jnp.transpose(weight_oihw, (2, 3, 1, 0))
    conv = jax.lax.conv_general_dilated(
        x, w_hwio, window_strides=(1, 1), padding=((1, 1), (1, 1)),
        dimension_numbers=("NHWC", "HWIO", "NHWC"))
    return x + conv + bias.reshape(1, 1, 1, -1)


if __name__ == "__main__":
    key = jax.random.PRNGKey(0)
    k_x, k_w, k_b = jax.random.split(key, 3)

    N, C, H, W = 2, 4, 16, 16
    x_nhwc = jax.random.normal(k_x, (N, H, W, C), dtype=jnp.float32)
    weight = jax.random.normal(k_w, (C, C, 3, 3), dtype=jnp.float32) * 0.1
    bias = jax.random.normal(k_b, (C,), dtype=jnp.float32) * 0.1

    ref = _reference_nhwc(x_nhwc, weight, bias)

    # Default path: bf16 MXU operands, f32 accumulate + f32 residual/bias epilogue.
    # Auto tile_rows picks TH=8 here (2 row tiles per image -> exercises the halo path).
    out = jax.block_until_ready(shortcut_block_nhwc(x_nhwc, weight, bias))
    assert out.shape == (N, H, W, C)
    assert jnp.allclose(out, ref, atol=2e-2, rtol=2e-2)

    # Full-f32 operand path: tight tolerance, smaller tiles (more halo crossings).
    out32 = jax.block_until_ready(
        shortcut_block_nhwc(x_nhwc, weight, bias, tile_rows=4, compute_dtype=None))
    assert jnp.allclose(out32, ref, atol=1e-4, rtol=1e-4)

    # NCHW (PyTorch layout) wrapper parity.
    x_nchw = jnp.transpose(x_nhwc, (0, 3, 1, 2))
    out_nchw = jax.block_until_ready(shortcut_block(x_nchw, weight, bias))
    assert out_nchw.shape == (N, C, H, W)
    assert jnp.allclose(out_nchw, jnp.transpose(ref, (0, 3, 1, 2)), atol=2e-2, rtol=2e-2)

    print("KERNEL_OK")
</pallas_src>

<mosaic_0001>
module attributes {stable_mosaic.version = 11 : i64} {
  func.func @_shortcut_conv3x3_kernel(%arg0: i32, %arg1: i32, %arg2: memref<1x1x16x4xf32, #tpu.memory_space<vmem>>, %arg3: memref<1x8x16x4xf32, #tpu.memory_space<vmem>>, %arg4: memref<1x1x16x4xf32, #tpu.memory_space<vmem>>, %arg5: memref<3x4x384xbf16, #tpu.memory_space<vmem>>, %arg6: memref<1x1x4xf32, #tpu.memory_space<vmem>>, %arg7: memref<1x8x16x4xf32, #tpu.memory_space<vmem>>) attributes {dimension_semantics = [#tpu.dimension_semantics<parallel>, #tpu.dimension_semantics<parallel>], iteration_bounds = array<i64: 2, 2>, scalar_prefetch = 0 : i64, scratch_operands = 0 : i64, tpu.core_type = #tpu.core_type<tc>, window_params = [{transform_indices = @transform_0, window_bounds = array<i64: 1, 1, 16, 4>}, {transform_indices = @transform_1, window_bounds = array<i64: 1, 8, 16, 4>}, {transform_indices = @transform_2, window_bounds = array<i64: 1, 1, 16, 4>}, {pipeline_mode = #tpu.pipeline_mode<synchronous>, transform_indices = @transform_3, window_bounds = array<i64: 3, 4, 384>}, {pipeline_mode = #tpu.pipeline_mode<synchronous>, transform_indices = @transform_4, window_bounds = array<i64: 1, 1, 4>}, {transform_indices = @transform_5, window_bounds = array<i64: 1, 8, 16, 4>}]} {
    %c0 = arith.constant 0 : index
    %c0_0 = arith.constant 0 : index
    %c0_1 = arith.constant 0 : index
    %c0_2 = arith.constant 0 : index
    %0 = vector.load %arg3[%c0, %c0_0, %c0_1, %c0_2] : memref<1x8x16x4xf32, #tpu.memory_space<vmem>>, vector<1x8x16x4xf32>
    %1 = vector.shape_cast %0 : vector<1x8x16x4xf32> to vector<8x16x4xf32>
    %2 = arith.truncf %1 : vector<8x16x4xf32> to vector<8x16x4xbf16>
    %c0_3 = arith.constant 0 : index
    %c0_4 = arith.constant 0 : index
    %c0_5 = arith.constant 0 : index
    %c0_6 = arith.constant 0 : index
    %3 = vector.load %arg2[%c0_3, %c0_4, %c0_5, %c0_6] : memref<1x1x16x4xf32, #tpu.memory_space<vmem>>, vector<1x1x16x4xf32>
    %4 = vector.shape_cast %3 : vector<1x1x16x4xf32> to vector<1x16x4xf32>
    %5 = arith.truncf %4 : vector<1x16x4xf32> to vector<1x16x4xbf16>
    %c0_i32 = arith.constant 0 : i32
    %6 = arith.cmpi sgt, %arg1, %c0_i32 : i32
    %7 = arith.extui %6 : i1 to i32
    %8 = arith.sitofp %7 : i32 to f32
    %9 = arith.truncf %8 : f32 to bf16
    %10 = vector.broadcast %9 : bf16 to vector<1x16x4xbf16>
    %11 = arith.mulf %5, %10 : vector<1x16x4xbf16>
    %c0_7 = arith.constant 0 : index
    %c0_8 = arith.constant 0 : index
    %c0_9 = arith.constant 0 : index
    %c0_10 = arith.constant 0 : index
    %12 = vector.load %arg4[%c0_7, %c0_8, %c0_9, %c0_10] : memref<1x1x16x4xf32, #tpu.memory_space<vmem>>, vector<1x1x16x4xf32>
    %13 = vector.shape_cast %12 : vector<1x1x16x4xf32> to vector<1x16x4xf32>
    %14 = arith.truncf %13 : vector<1x16x4xf32> to vector<1x16x4xbf16>
    %c1_i32 = arith.constant 1 : i32
    %15 = arith.cmpi slt, %arg1, %c1_i32 : i32
    %16 = arith.extui %15 : i1 to i32
    %17 = arith.sitofp %16 : i32 to f32
    %18 = arith.truncf %17 : f32 to bf16
    %19 = vector.broadcast %18 : bf16 to vector<1x16x4xbf16>
    %20 = arith.mulf %14, %19 : vector<1x16x4xbf16>
    %21 = tpu.concatenate %11, %2, %20 in 0 : vector<1x16x4xbf16>, vector<8x16x4xbf16>, vector<1x16x4xbf16> -> vector<10x16x4xbf16>
    %22 = tpu.iota {dimensions = array<i32: 1>} : vector<1x16x1xi32>
    %c0_i32_11 = arith.constant 0 : i32
    %23 = vector.broadcast %c0_i32_11 : i32 to vector<1x16x1xi32>
    %24 = arith.cmpi ne, %22, %23 : vector<1x16x1xi32>
    %25 = arith.extui %24 : vector<1x16x1xi1> to vector<1x16x1xi32>
    %26 = arith.sitofp %25 : vector<1x16x1xi32> to vector<1x16x1xf32>
    %c15_i32 = arith.constant 15 : i32
    %27 = vector.broadcast %c15_i32 : i32 to vector<1x16x1xi32>
    %28 = arith.cmpi ne, %22, %27 : vector<1x16x1xi32>
    %29 = arith.extui %28 : vector<1x16x1xi1> to vector<1x16x1xi32>
    %30 = arith.sitofp %29 : vector<1x16x1xi32> to vector<1x16x1xf32>
    %31 = vector.extract_strided_slice %21 {offsets = [0, 0, 0], sizes = [8, 16, 4], strides = [1, 1, 1]} : vector<10x16x4xbf16> to vector<8x16x4xbf16>
    %32 = vector.shape_cast %31 : vector<8x16x4xbf16> to vector<128x4xbf16>
    %c0_12 = arith.constant 0 : index
    %c0_13 = arith.constant 0 : index
    %c0_14 = arith.constant 0 : index
    %33 = vector.load %arg5[%c0_12, %c0_13, %c0_14] : memref<3x4x384xbf16, #tpu.memory_space<vmem>>, vector<1x4x384xbf16>
    %34 = vector.shape_cast %33 : vector<1x4x384xbf16> to vector<4x384xbf16>
    %cst = arith.constant dense<0.000000e+00> : vector<128x384xf32>
    %35 = tpu.matmul %32, %34, %cst {dimension_numbers = #tpu.dot_dimension_numbers<[1], [0], [0], [1], [0, 0, 1, 1], [], []>} : vector<128x4xbf16>, vector<4x384xbf16>, vector<128x384xf32> -> vector<128x384xf32>
    %36 = vector.shape_cast %35 : vector<128x384xf32> to vector<8x16x384xf32>
    %37 = vector.extract_strided_slice %36 {offsets = [0, 0, 0], sizes = [8, 16, 128], strides = [1, 1, 1]} : vector<8x16x384xf32> to vector<8x16x128xf32>
    %c1_i32_15 = arith.constant 1 : i32
    %38 = tpu.dynamic_rotate %37 by %c1_i32_15 dim 1 : vector<8x16x128xf32>, i32 -> vector<8x16x128xf32>
    %39 = vector.broadcast %26 : vector<1x16x1xf32> to vector<8x16x128xf32>
    %40 = arith.mulf %38, %39 : vector<8x16x128xf32>
    %41 = vector.extract_strided_slice %36 {offsets = [0, 0, 128], sizes = [8, 16, 128], strides = [1, 1, 1]} : vector<8x16x384xf32> to vector<8x16x128xf32>
    %42 = vector.extract_strided_slice %36 {offsets = [0, 0, 256], sizes = [8, 16, 128], strides = [1, 1, 1]} : vector<8x16x384xf32> to vector<8x16x128xf32>
    %c15_i32_16 = arith.constant 15 : i32
    %43 = tpu.dynamic_rotate %42 by %c15_i32_16 dim 1 : vector<8x16x128xf32>, i32 -> vector<8x16x128xf32>
    %44 = vector.broadcast %30 : vector<1x16x1xf32> to vector<8x16x128xf32>
    %45 = arith.mulf %43, %44 : vector<8x16x128xf32>
    %46 = arith.addf %40, %41 : vector<8x16x128xf32>
    %47 = arith.addf %46, %45 : vector<8x16x128xf32>
    %48 = vector.extract_strided_slice %21 {offsets = [1, 0, 0], sizes = [8, 16, 4], strides = [1, 1, 1]} : vector<10x16x4xbf16> to vector<8x16x4xbf16>
    %49 = vector.shape_cast %48 : vector<8x16x4xbf16> to vector<128x4xbf16>
    %c1 = arith.constant 1 : index
    %c0_17 = arith.constant 0 : index
    %c0_18 = arith.constant 0 : index
    %50 = vector.load %arg5[%c1, %c0_17, %c0_18] : memref<3x4x384xbf16, #tpu.memory_space<vmem>>, vector<1x4x384xbf16>
    %51 = vector.shape_cast %50 : vector<1x4x384xbf16> to vector<4x384xbf16>
    %cst_19 = arith.constant dense<0.000000e+00> : vector<128x384xf32>
    %52 = tpu.matmul %49, %51, %cst_19 {dimension_numbers = #tpu.dot_dimension_numbers<[1], [0], [0], [1], [0, 0, 1, 1], [], []>} : vector<128x4xbf16>, vector<4x384xbf16>, vector<128x384xf32> -> vector<128x384xf32>
    %53 = vector.shape_cast %52 : vector<128x384xf32> to vector<8x16x384xf32>
    %54 = vector.extract_strided_slice %53 {offsets = [0, 0, 0], sizes = [8, 16, 128], strides = [1, 1, 1]} : vector<8x16x384xf32> to vector<8x16x128xf32>
    %c1_i32_20 = arith.constant 1 : i32
    %55 = tpu.dynamic_rotate %54 by %c1_i32_20 dim 1 : vector<8x16x128xf32>, i32 -> vector<8x16x128xf32>
    %56 = vector.broadcast %26 : vector<1x16x1xf32> to vector<8x16x128xf32>
    %57 = arith.mulf %55, %56 : vector<8x16x128xf32>
    %58 = vector.extract_strided_slice %53 {offsets = [0, 0, 128], sizes = [8, 16, 128], strides = [1, 1, 1]} : vector<8x16x384xf32> to vector<8x16x128xf32>
    %59 = vector.extract_strided_slice %53 {offsets = [0, 0, 256], sizes = [8, 16, 128], strides = [1, 1, 1]} : vector<8x16x384xf32> to vector<8x16x128xf32>
    %c15_i32_21 = arith.constant 15 : i32
    %60 = tpu.dynamic_rotate %59 by %c15_i32_21 dim 1 : vector<8x16x128xf32>, i32 -> vector<8x16x128xf32>
    %61 = vector.broadcast %30 : vector<1x16x1xf32> to vector<8x16x128xf32>
    %62 = arith.mulf %60, %61 : vector<8x16x128xf32>
    %63 = arith.addf %57, %58 : vector<8x16x128xf32>
    %64 = arith.addf %63, %62 : vector<8x16x128xf32>
    %65 = arith.addf %47, %64 : vector<8x16x128xf32>
    %66 = vector.extract_strided_slice %21 {offsets = [2, 0, 0], sizes = [8, 16, 4], strides = [1, 1, 1]} : vector<10x16x4xbf16> to vector<8x16x4xbf16>
    %67 = vector.shape_cast %66 : vector<8x16x4xbf16> to vector<128x4xbf16>
    %c2 = arith.constant 2 : index
    %c0_22 = arith.constant 0 : index
    %c0_23 = arith.constant 0 : index
    %68 = vector.load %arg5[%c2, %c0_22, %c0_23] : memref<3x4x384xbf16, #tpu.memory_space<vmem>>, vector<1x4x384xbf16>
    %69 = vector.shape_cast %68 : vector<1x4x384xbf16> to vector<4x384xbf16>
    %cst_24 = arith.constant dense<0.000000e+00> : vector<128x384xf32>
    %70 = tpu.matmul %67, %69, %cst_24 {dimension_numbers = #tpu.dot_dimension_numbers<[1], [0], [0], [1], [0, 0, 1, 1], [], []>} : vector<128x4xbf16>, vector<4x384xbf16>, vector<128x384xf32> -> vector<128x384xf32>
    %71 = vector.shape_cast %70 : vector<128x384xf32> to vector<8x16x384xf32>
    %72 = vector.extract_strided_slice %71 {offsets = [0, 0, 0], sizes = [8, 16, 128], strides = [1, 1, 1]} : vector<8x16x384xf32> to vector<8x16x128xf32>
    %c1_i32_25 = arith.constant 1 : i32
    %73 = tpu.dynamic_rotate %72 by %c1_i32_25 dim 1 : vector<8x16x128xf32>, i32 -> vector<8x16x128xf32>
    %74 = vector.broadcast %26 : vector<1x16x1xf32> to vector<8x16x128xf32>
    %75 = arith.mulf %73, %74 : vector<8x16x128xf32>
    %76 = vector.extract_strided_slice %71 {offsets = [0, 0, 128], sizes = [8, 16, 128], strides = [1, 1, 1]} : vector<8x16x384xf32> to vector<8x16x128xf32>
    %77 = vector.extract_strided_slice %71 {offsets = [0, 0, 256], sizes = [8, 16, 128], strides = [1, 1, 1]} : vector<8x16x384xf32> to vector<8x16x128xf32>
    %c15_i32_26 = arith.constant 15 : i32
    %78 = tpu.dynamic_rotate %77 by %c15_i32_26 dim 1 : vector<8x16x128xf32>, i32 -> vector<8x16x128xf32>
    %79 = vector.broadcast %30 : vector<1x16x1xf32> to vector<8x16x128xf32>
    %80 = arith.mulf %78, %79 : vector<8x16x128xf32>
    %81 = arith.addf %75, %76 : vector<8x16x128xf32>
    %82 = arith.addf %81, %80 : vector<8x16x128xf32>
    %83 = arith.addf %65, %82 : vector<8x16x128xf32>
    %84 = vector.extract_strided_slice %83 {offsets = [0, 0, 0], sizes = [8, 16, 4], strides = [1, 1, 1]} : vector<8x16x128xf32> to vector<8x16x4xf32>
    %85 = arith.addf %84, %1 : vector<8x16x4xf32>
    %c0_27 = arith.constant 0 : index
    %c0_28 = arith.constant 0 : index
    %c0_29 = arith.constant 0 : index
    %86 = vector.load %arg6[%c0_27, %c0_28, %c0_29] : memref<1x1x4xf32, #tpu.memory_space<vmem>>, vector<1x1x4xf32>
    %87 = vector.broadcast %86 : vector<1x1x4xf32> to vector<8x16x4xf32>
    %88 = arith.addf %85, %87 : vector<8x16x4xf32>
    %c0_30 = arith.constant 0 : index
    %c0_31 = arith.constant 0 : index
    %c0_32 = arith.constant 0 : index
    %c0_33 = arith.constant 0 : index
    %89 = vector.load %arg7[%c0_30, %c0_31, %c0_32, %c0_33] : memref<1x8x16x4xf32, #tpu.memory_space<vmem>>, vector<1x8x16x4xf32>
    %90 = vector.shape_cast %89 : vector<1x8x16x4xf32> to vector<8x16x4xf32>
    %91 = vector.shape_cast %88 : vector<8x16x4xf32> to vector<1x8x16x4xf32>
    tpu.vector_store %arg7[%c0_30, %c0_31, %c0_32, %c0_33], %91 {strides = array<i32>} : memref<1x8x16x4xf32, #tpu.memory_space<vmem>>, vector<1x8x16x4xf32>,
    return
  }
  func.func @transform_0(%arg0: i32, %arg1: i32) -> (i32, i32, i32, i32) {
    %c8_i32 = arith.constant 8 : i32
    %0 = arith.muli %arg1, %c8_i32 : i32
    %c1_i32 = arith.constant 1 : i32
    %1 = arith.subi %0, %c1_i32 : i32
    %c0_i32 = arith.constant 0 : i32
    %2 = arith.maxsi %1, %c0_i32 : i32
    %c0_i32_0 = arith.constant 0 : i32
    %c0_i32_1 = arith.constant 0 : i32
    %c0_i32_2 = arith.constant 0 : i32
    return %arg0, %2, %c0_i32_0, %c0_i32_1 : i32, i32, i32, i32
  }
  func.func @transform_1(%arg0: i32, %arg1: i32) -> (i32, i32, i32, i32) {
    %c0_i32 = arith.constant 0 : i32
    %c0_i32_0 = arith.constant 0 : i32
    %c0_i32_1 = arith.constant 0 : i32
    return %arg0, %arg1, %c0_i32, %c0_i32_0 : i32, i32, i32, i32
  }
  func.func @transform_2(%arg0: i32, %arg1: i32) -> (i32, i32, i32, i32) {
    %c1_i32 = arith.constant 1 : i32
    %0 = arith.addi %arg1, %c1_i32 : i32
    %c8_i32 = arith.constant 8 : i32
    %1 = arith.muli %0, %c8_i32 : i32
    %c15_i32 = arith.constant 15 : i32
    %2 = arith.minsi %1, %c15_i32 : i32
    %c0_i32 = arith.constant 0 : i32
    %c0_i32_0 = arith.constant 0 : i32
    %c0_i32_1 = arith.constant 0 : i32
    return %arg0, %2, %c0_i32, %c0_i32_0 : i32, i32, i32, i32
  }
  func.func @transform_3(%arg0: i32, %arg1: i32) -> (i32, i32, i32) {
    %c0_i32 = arith.constant 0 : i32
    %c0_i32_0 = arith.constant 0 : i32
    %c0_i32_1 = arith.constant 0 : i32
    %c0_i32_2 = arith.constant 0 : i32
    return %c0_i32, %c0_i32_0, %c0_i32_1 : i32, i32, i32
  }
  func.func @transform_4(%arg0: i32, %arg1: i32) -> (i32, i32, i32) {
    %c0_i32 = arith.constant 0 : i32
    %c0_i32_0 = arith.constant 0 : i32
    %c0_i32_1 = arith.constant 0 : i32
    %c0_i32_2 = arith.constant 0 : i32
    return %c0_i32, %c0_i32_0, %c0_i32_1 : i32, i32, i32
  }
  func.func @transform_5(%arg0: i32, %arg1: i32) -> (i32, i32, i32, i32) {
    %c0_i32 = arith.constant 0 : i32
    %c0_i32_0 = arith.constant 0 : i32
    %c0_i32_1 = arith.constant 0 : i32
    return %arg0, %arg1, %c0_i32, %c0_i32_0 : i32, i32, i32, i32
  }
}

</mosaic_0001>

<bundles_post_ra>
// kernel: tpu_custom_call.1
= control target key start
LH: loop header
LB: loop body
LE: loop exit
PB: predicated region body
PF: predicated region fallthrough
CT: control target
= control target key end

     0   :  { %s2157_s18 = smov 0   ;;  %s2159_s19 = smov 0   ;;  %s2882_s0 = inlined_call_operand.vmem [shape: f32[2,16,16,4], index: 0, kind: input, shape index: {}]   ;;  %s2883_s1 = inlined_call_operand.vmem [shape: f32[2,16,16,4], index: 1, kind: input, shape index: {}]   ;;  %s2884_s2 = inlined_call_operand.vmem [shape: f32[2,16,16,4], index: 2, kind: input, shape index: {}]   ;;  %s2885_s3 = inlined_call_operand.vmem [shape: bf16[3,4,384], index: 3, kind: input, shape index: {}]   ;;  %s2886_s4 = inlined_call_operand.vmem [shape: f32[1,1,4], index: 4, kind: input, shape index: {}]   ;;  %s2887_s5 = inlined_call_operand.vmem [shape: f32[2,16,16,4], index: 5, kind: output, shape index: {}]  }
   0x1   :  { %s2161_s20 = smov 0   ;;  %s2163_s21 = smov 0  }
   0x2   :  { %s2165_s22 = smov 0  }
   0x3 LB: > { %s24_s23 = sadd.s32 1, %s2114_s20  ;;  %s27_s24 = sadd.s32 1, %s2118_s21  ;;  %s2122_s22 = sphi %s2165_s22, %s15_s22   ;;  %s2118_s21 = sphi %s2163_s21, %s2892_s21   ;;  %s2114_s20 = sphi %s2161_s20, %s2891_s20   ;;  %s2110_s19 = sphi %s2159_s19, %s2890_s19   ;;  %s2106_s18 = sphi %s2157_s18, %s2889_s18  }
   0x4   : > { %p25_p0 = scmp.ge.s32.totalorder %s24_s23, 2  ;;  %p1844_p1 = scmp.ge.s32.totalorder %s2122_s22, 1 }
   0x5   : > { %p273_p2 = scmp.lt.s32.totalorder %s2122_s22, 5 }
   0x6   : > { %s2894_s23 = smov (%p25_p0, %s24_s23), 0  ;;  %s2896_s24 = smov (!%p25_p0, %s27_s24), %s2118_s21 }
   0x7   : > { %p274_p3 = pnand %p1844_p1, %p273_p2  ;;  %p29_p4 = scmp.ge.s32.totalorder %s2896_s24, 2 }
   0x8   : > { %v460_v0 = vlaneseq (!%p274_p3)  ;;  %v2124_v1 = vmov (!%p274_p3), 1983009808   ;;  %v2125_v3 = vmov (!%p274_p3), 0   ;;  %s2191_s25 = sshll.u32 (!%p274_p3), %s2106_s18, 3  ;;  %p341_p5 = scmp.lt.s32.totalorder (!%p274_p3), %s2110_s19, 1  ;;  %vm518_vm0 = vcmask (!%p274_p3), 1041408  }
   0x9   : > { %s2898_s24 = smov (%p29_p4, %s2896_s24), 0  ;;  %277 = sbr.rel (%p274_p3) target bundleno = 407 (0x197), region = 40 }
   0xa   : > { %v479_v2 = vunpack.c.l.s4 (!%p274_p3), %v2124_v1  ;;  %620 = vmatprep.mubr.bf16.mxu1 (!%p274_p3), %v2125_v3  ;;  %560 = vmatprep.mubr.bf16.mxu0 (!%p274_p3), %v2125_v3  ;;  %v2194_v4 = vshrl.u32 (!%p274_p3), %v460_v0, 7  ;;  %p357_p6 = scmp.lt.s32.totalorder (!%p274_p3), %s2191_s25, 15  ;;  %s2198_s26 = sadd.s32 (!%p274_p3), 4294967295, %s2191_s25  ;;  %v1889_v6 = vld [vmem:[%s2885_s3 + $0x6] sm:$0x3f] (!%p274_p3)  ;;  %vm493_vm1 = vcmask (!%p274_p3), 31744  }
   0xb   : > { %v475_v7 = vld [vmem:[%s2885_s3] sm:$0x3f] (!%p274_p3)  ;;  %v871_v8 = vcombine.high (!%p274_p3), %v1889_v6, %v1889_v6  ;;  %p339_p7 = scmp.gt.s32.totalorder (!%p274_p3), %s2198_s26, 0  ;;  %p421_p8 = scmp.gt.s32.totalorder (!%p274_p3), %s2106_s18, 0  ;;  %v1907_v27 = vld [vmem:[%s2885_s3 + $0xc] sm:$0x3f] (!%p274_p3) }
   0xc   : > { %v480_v5 = vunpack.c.0.s8 (!%p274_p3), %v479_v2  ;;  %v477_v9 = vcombine.high (!%p274_p3), %v475_v7, %v475_v7  ;;  %p1847_p9 = scmp.lt.s32.totalorder (!%p274_p3), %s2198_s26, 15  ;;  %s1935_s11 = sadd.s32 (!%p274_p3), 8, %s2191_s25  ;;  %v1256_v30 = vcombine.high (!%p274_p3), %v1907_v27, %v1907_v27  ;;  %vm463_vm2 = vcmp.ne.s32.totalorder (!%p274_p3), %v2194_v4, 0 }
   0xd   : > { %p2260_p11 = scmp.lt.s32.totalorder (!%p274_p3), %s1935_s11, 15  ;;  %p442_p12 = scmp.lt.s32.totalorder (!%p274_p3), %s2106_s18, 1  ;;  %vm754_vm3 = vcmp.lt.s32.totalorder (!%p274_p3), %v2194_v4, 1  ;;  %v2126_v2 = vmov (!%p274_p3), 0.0   ;;  %vm803_vm5 = vcmp.lt.s32.totalorder (!%p274_p3), %v2194_v4, 7 }
   0xe   : > { %v2208_v10 = vsub.s32 (!%p274_p3), %v480_v5, %v2194_v4  ;;  %v2416_v5 = vsel (!%p274_p3), %vm463_vm2, 1.0, %v2126_v2 }
  0x10   : > { %s2900_s19 = smov (!%p341_p5, %s2110_s19), 1  ;;  %v484_v11 = vrot.slane %v475_v7, %v2208_v10  ;;  %v885_v12 = vrot.slane %v871_v8, %v2208_v10  ;;  %v491_v15 = vrot.slane %v477_v9, %v2208_v10  ;;  %v878_v16 = vrot.slane %v1889_v6, %v2208_v10  ;;  %s2906_s11 = smov (!%p2260_p11, %s1935_s11), 15 }
  0x11   : > { %s358_s6 = scalar_select %p357_p6, %s2191_s25, 15  ;;  %v1263_v29 = vrot.slane %v1907_v27, %v2208_v10  ;;  %v1270_v41 = vrot.slane %v1256_v30, %v2208_v10 }
  0x12   : > { %s2210_s7 = sshll.u32 %s2900_s19, 5  ;;  %v492_v13 = vcombine.high %v484_v11, %v484_v11  ;;  %v520_v14 = vsel %vm518_vm0, %v484_v11, 0  ;;  %v526_v20 = vsel %vm518_vm0, %v491_v15, 0  ;;  %v886_v21 = vcombine.high %v878_v16, %v878_v16  ;;  %s2908_s11 = smov (!%p2260_p11, %s2906_s11), 15 }
  0x13   : > { %s1856_s8 = sshll.u32 %s358_s6, 1  ;;  %v897_v35 = vsel %vm518_vm0, %v885_v12, 0  ;;  %v1271_v38 = vcombine.high %v1263_v29, %v1263_v29  ;;  %v891_v40 = vsel %vm518_vm0, %v878_v16, 0  ;;  %v1282_v52 = vsel %vm518_vm0, %v1270_v41, 0 }
  0x14   : > { %s2215_s9 = sadd.s32 %s1856_s8, %s2210_s7  ;;  %2017 = vmatprep.subr.msk.bf16.mxu1 %vm518_vm0, %v492_v13  ;;  %1872 = vmatprep.subr.msk.bf16.mxu0 %vm518_vm0, %v492_v13  ;;  %v1276_v53 = vsel %vm518_vm0, %v1263_v29, 0 }
  0x15   : > { %s1858_s10 = sshll.u32 %s2215_s9, 3  ;;  %2018 = vmatpush1.bf16.msra.mxu1 %v520_v14  ;;  %529 = vmatpush1.bf16.msra.mxu0 %v520_v14 }
  0x16   : > { %s2227_s13 = scalar_lea.vmem %s2883_s1, %s1858_s10  ;;  %2020 = vmatprep.subr.msk.bf16.mxu0 %vm518_vm0, %v885_v12  ;;  %2019 = vmatprep.subr.msk.bf16.mxu1 %vm518_vm0, %v491_v15 }
  0x17   : > { %v404_v17 = vld [vmem:[%s2227_s13 + $0x50] sm:$0xff]  ;;  %v405_v18 = vld [vmem:[%s2227_s13 + $0x58] sm:$0xff]  ;;  %s340_s14 = scalar_select %p339_p7, %s2198_s26, 0  ;;  %v406_v22 = vld [vmem:[%s2227_s13 + $0x60] sm:$0xff] }
  0x18   : > { %v2238_v19 = vpack.c.bf16 %v405_v18, %v404_v17  ;;  %s422_s15 = scalar_select %p421_p8, 1, 0  ;;  %v407_v23 = vld [vmem:[%s2227_s13 + $0x68] sm:$0xff]  ;;  %v394_v32 = vld [vmem:[%s2227_s13] sm:$0xff]  ;;  %v396_v36 = vld [vmem:[%s2227_s13 + $0x10] sm:$0xff] }
  0x19   : > { %s2902_s14 = smov (!%p1847_p9, %s340_s14), 15  ;;  %v2258_v24 = vpack.c.bf16 %v407_v23, %v406_v22  ;;  %v395_v33 = vld [vmem:[%s2227_s13 + $0x8] sm:$0xff]  ;;  %v397_v37 = vld [vmem:[%s2227_s13 + $0x18] sm:$0xff]  ;;  %v398_v43 = vld [vmem:[%s2227_s13 + $0x20] sm:$0xff] }
  0x1a   : > { %s423_s16 = scvt.s32.f32 %s422_s15  ;;  %s1852_s17 = sshll.u32 %s2902_s14, 1  ;;  %1879 = vmatmul.mubr.msk.bf16.vlgmr.msra.gmra.mrb[0].mxu1 %vm493_vm1, %v2238_v19  ;;  %v410_v39 = vpack.c.bf16 %v395_v33, %v394_v32  ;;  %v2289_v42 = vpack.c.bf16 %v397_v37, %v396_v36  ;;  %v399_v44 = vld [vmem:[%s2227_s13 + $0x28] sm:$0xff]  ;;  %v400_v45 = vld [vmem:[%s2227_s13 + $0x30] sm:$0xff]  ;;  %v401_v46 = vld [vmem:[%s2227_s13 + $0x38] sm:$0xff] }
  0x1b   : > { %s347_s19 = sadd.s32 %s2210_s7, %s1852_s17  ;;  %1964 = vmatpush3.bf16.msra.mxu1 %v526_v20  ;;  %630 = vmatprep.mubr.bf16.mxu1 %v2125_v3  ;;  %v2300_v47 = vpack.c.bf16 %v399_v44, %v398_v43  ;;  %v2302_v48 = vpack.c.bf16 %v401_v46, %v400_v45  ;;  %v402_v49 = vld [vmem:[%s2227_s13 + $0x40] sm:$0xff]  ;;  %v403_v50 = vld [vmem:[%s2227_s13 + $0x48] sm:$0xff]  ;;  %v408_v54 = vld [vmem:[%s2227_s13 + $0x70] sm:$0xff]  ;;  %v462_v20 = vadd.s32 8, %v2194_v4 }
  0x1c   : > { %p425_p10 = scmp.ne.f32.partialorder %s423_s16, %s423_s16  ;;  %s1854_s27 = sshll.u32 %s347_s19, 3  ;;  %1890 = vmatprep.subr.msk.bf16.mxu1 %vm518_vm0, %v886_v21  ;;  %v2312_v51 = vpack.c.bf16 %v403_v50, %v402_v49  ;;  %v409_v55 = vld [vmem:[%s2227_s13 + $0x78] sm:$0xff] }
  0x1d   : > { %s426_s28 = sshrl.u32 %s423_s16, 16  ;;  %s349_s30 = scalar_lea.vmem %s2882_s0, %s1854_s27  ;;  %v417_v56 = vpack.c.bf16 %v409_v55, %v408_v54  ;;  %vm470_vm4 = vcmp.ne.s32.totalorder %v462_v20, 15 }
  0x1e   : > { %s427_s6 = sand.u32 1, %s426_s28  ;;  %v418_v25 = vld [vmem:[%s349_s30] sm:$0xff]  ;;  %v419_v26 = vld [vmem:[%s349_s30 + $0x8] sm:$0xff] }
  0x1f   : > { %s428_s8 = sadd.s32 32767, %s427_s6  ;;  %v420_v28 = vpack.c.bf16 %v419_v26, %v418_v25 }
  0x20   : > { %s429_s12 = sadd.s32 %s428_s8, %s423_s16  ;;  %s2280_s16 = sshll.u32 %s2908_s11, 1 }
  0x21   : > { %s430_s15 = sand.u32 4294901760, %s429_s12  ;;  %s375_s26 = sadd.s32 %s2280_s16, %s2210_s7 }
  0x22   : > { %s2904_s15 = smov (%p425_p10, %s430_s15), 2143289344  ;;  %1880 = vmatmul.mubr.msk.bf16.gmra.mrb[4].mxu1 %vm493_vm1, %v2258_v24  ;;  %s1865_s14 = sshll.u32 %s375_s26, 3 }
  0x23   : > { %s433_s25 = sshrl.u32 %s2904_s15, 16 }
  0x24   : > { %s434_s27 = sshll.u32 %s433_s25, 16 }
  0x25   : > { %s435_s28 = sor.u32 %s434_s27, %s433_s25  ;;  %s377_s25 = scalar_lea.vmem %s2884_s2, %s1865_s14 }
  0x26   : > { %v436_v31 = vstv %s435_s28  ;;  %s443_s29 = scalar_select %p442_p12, 1, 0  ;;  %v439_v57 = vld [vmem:[%s377_s25] sm:$0xff]  ;;  %v440_v58 = vld [vmem:[%s377_s25 + $0x8] sm:$0xff] }
  0x27   : > { %v438_v34 = vmul.bf16 %v436_v31, %v420_v28  ;;  %v441_v59 = vpack.c.bf16 %v440_v58, %v439_v57 }
  0x28   : > { %s444_s30 = scvt.s32.f32 %s443_s29 }
  0x29   : > { %1873 = vmatmul.mubr.msk.bf16.vlgmr.msra.gmra.mrb[0].mxu0 %vm493_vm1, %v438_v34  ;;  %1965 = vmatprep.mubr.msk.bf16.mxu1 %vm493_vm1, %v438_v34 }
  0x2a   : > { %1982 = vmatpush3.bf16.msra.mxu0 %v897_v35  ;;  %570 = vmatprep.mubr.bf16.mxu0 %v2125_v3  ;;  %s447_s6 = sshrl.u32 %s444_s30, 16  ;;  %p446_p13 = scmp.ne.f32.partialorder %s444_s30, %s444_s30 }
  0x2b   : > { %1966 = vmatmul.mubr.msk.bf16.vlgmr.msra.gmra.mrb[8].mxu1 %vm493_vm1, %v410_v39  ;;  %1908 = vmatprep.subr.msk.bf16.mxu0 %vm518_vm0, %v1271_v38  ;;  %s448_s18 = sand.u32 1, %s447_s6 }
  0x2c   : > { %900 = vmatpush1.bf16.msra.mxu1 %v891_v40  ;;  %1969 = vmatprep.mubr.msk.bf16.mxu1 %vm493_vm1, %v2289_v42  ;;  %s449_s8 = sadd.s32 32767, %s448_s18 }
  0x2d   : > { %2021 = vmatprep.subr.msk.bf16.mxu1 %vm518_vm0, %v1270_v41  ;;  %s450_s11 = sadd.s32 %s449_s8, %s444_s30  ;;  %v2443_v41 = vsel %vm470_vm4, 1.0, %v2126_v2  ;;  %s2737_s30 = scalar_lea.vmem %s2887_s5, %s1858_s10 }
  0x2e   : > { %s451_s12 = sand.u32 4294901760, %s450_s11 }
  0x2f   : > { %s2910_s12 = smov (%p446_p13, %s451_s12), 2143289344 }
  0x30   : > { %s454_s15 = sshrl.u32 %s2910_s12, 16 }
  0x31   : > { %1874 = vmatmul.mubr.msk.bf16.gmra.mrb[4].mxu0 %vm493_vm1, %v410_v39  ;;  %s455_s27 = sshll.u32 %s454_s15, 16 }
  0x32   : > { %580 = vmatprep.mubr.bf16.mxu0 %v2125_v3  ;;  %s456_s28 = sor.u32 %s455_s27, %s454_s15 }
  0x33   : > { %1970 = vmatmul.mubr.msk.bf16.gmra.mrb[12].mxu1 %vm493_vm1, %v2300_v47  ;;  %v457_v60 = vstv %s456_s28 }
  0x34   : > { %1973 = vmatprep.mubr.msk.bf16.mxu1 %vm493_vm1, %v2302_v48  ;;  %v459_v61 = vmul.bf16 %v457_v60, %v441_v59 }
  0x39   : > { %1875 = vmatmul.mubr.msk.bf16.gmra.mrb[8].mxu0 %vm493_vm1, %v2289_v42 }
  0x3a   : > { %590 = vmatprep.mubr.bf16.mxu0 %v2125_v3 }
  0x3b   : > { %1974 = vmatmul.mubr.msk.bf16.gmra.mrb[16].mxu1 %vm493_vm1, %v2312_v51 }
  0x3c   : > { %1977 = vmatprep.mubr.msk.bf16.mxu1 %vm493_vm1, %v2238_v19 }
  0x41   : > { %1876 = vmatmul.mubr.msk.bf16.gmra.mrb[12].mxu0 %vm493_vm1, %v2300_v47 }
  0x42   : > { %600 = vmatprep.mubr.bf16.mxu0 %v2125_v3 }
  0x43   : > { %1978 = vmatmul.mubr.msk.bf16.gmra.mrb[20].mxu1 %vm493_vm1, %v2258_v24 }
  0x44   : > { %931 = vmatprep.mubr.bf16.mxu1 %v2125_v3 }
  0x49   : > { %1877 = vmatmul.mubr.msk.bf16.gmra.mrb[16].mxu0 %vm493_vm1, %v2302_v48 }
  0x4a   : > { %610 = vmatprep.mubr.bf16.mxu0 %v2125_v3 }
  0x4b   : > { %1891 = vmatmul.mubr.msk.bf16.vlgmr.msra.gmra.mrb[24].mxu1 %vm493_vm1, %v410_v39 }
  0x4c   : > { %2000 = vmatpush3.bf16.msra.mxu1 %v1282_v52  ;;  %941 = vmatprep.mubr.bf16.mxu1 %v2125_v3 }
  0x51   : > { %1878 = vmatmul.mubr.msk.bf16.gmra.mrb[20].mxu0 %vm493_vm1, %v2312_v51 }
  0x52   : > { %1983 = vmatprep.mubr.msk.bf16.mxu0 %vm493_vm1, %v410_v39 }
  0x53   : > { %1892 = vmatmul.mubr.msk.bf16.gmra.mrb[28].mxu1 %vm493_vm1, %v2289_v42 }
  0x54   : > { %951 = vmatprep.mubr.bf16.mxu1 %v2125_v3 }
  0x59   : > { %1984 = vmatmul.mubr.msk.bf16.vlgmr.msra.gmra.mrb[24].mxu0 %vm493_vm1, %v2289_v42 }
  0x5a   : > { %1285 = vmatpush1.bf16.msra.mxu0 %v1276_v53  ;;  %1987 = vmatprep.mubr.msk.bf16.mxu0 %vm493_vm1, %v2300_v47 }
  0x5b   : > { %1893 = vmatmul.mubr.msk.bf16.gmra.mrb[32].mxu1 %vm493_vm1, %v2300_v47 }
  0x5c   : > { %961 = vmatprep.mubr.bf16.mxu1 %v2125_v3 }
  0x61   : > { %1988 = vmatmul.mubr.msk.bf16.gmra.mrb[28].mxu0 %vm493_vm1, %v2302_v48 }
  0x62   : > { %1991 = vmatprep.mubr.msk.bf16.mxu0 %vm493_vm1, %v2312_v51 }
  0x63   : > { %1894 = vmatmul.mubr.msk.bf16.gmra.mrb[36].mxu1 %vm493_vm1, %v2302_v48 }
  0x64   : > { %971 = vmatprep.mubr.bf16.mxu1 %v2125_v3 }
  0x69   : > { %1992 = vmatmul.mubr.msk.bf16.gmra.mrb[32].mxu0 %vm493_vm1, %v2238_v19 }
  0x6a   : > { %1995 = vmatprep.mubr.msk.bf16.mxu0 %vm493_vm1, %v2258_v24 }
  0x6b   : > { %1895 = vmatmul.mubr.msk.bf16.gmra.mrb[40].mxu1 %vm493_vm1, %v2312_v51 }
  0x6c   : > { %981 = vmatprep.mubr.bf16.mxu1 %v2125_v3 }
  0x71   : > { %1996 = vmatmul.mubr.msk.bf16.gmra.mrb[36].mxu0 %vm493_vm1, %v417_v56 }
  0x72   : > { %1316 = vmatprep.mubr.bf16.mxu0 %v2125_v3 }
  0x73   : > { %1896 = vmatmul.mubr.msk.bf16.gmra.mrb[44].mxu1 %vm493_vm1, %v2238_v19 }
  0x74   : > { %991 = vmatprep.mubr.bf16.mxu1 %v2125_v3 }
  0x79   : > { %1909 = vmatmul.mubr.msk.bf16.vlgmr.msra.gmra.mrb[40].mxu0 %vm493_vm1, %v2289_v42 }
  0x7a   : > { %1326 = vmatprep.mubr.bf16.mxu0 %v2125_v3 }
  0x7b   : > { %1897 = vmatmul.mubr.msk.bf16.gmra.mrb[48].mxu1 %vm493_vm1, %v2258_v24 }
  0x7c   : > { %1001 = vmatprep.mubr.bf16.mxu1 %v2125_v3 }
  0x81   : > { %1910 = vmatmul.mubr.msk.bf16.gmra.mrb[44].mxu0 %vm493_vm1, %v2300_v47 }
  0x82   : > { %1336 = vmatprep.mubr.bf16.mxu0 %v2125_v3 }
  0x83   : > { %1898 = vmatmul.mubr.msk.bf16.gmra.mrb[52].mxu1 %vm493_vm1, %v417_v56 }
  0x84   : > { %2001 = vmatprep.mubr.msk.bf16.mxu1 %vm493_vm1, %v2289_v42 }
  0x89   : > { %1911 = vmatmul.mubr.msk.bf16.gmra.mrb[48].mxu0 %vm493_vm1, %v2302_v48 }
  0x8a   : > { %1346 = vmatprep.mubr.bf16.mxu0 %v2125_v3 }
  0x8b   : > { %2002 = vmatmul.mubr.msk.bf16.vlgmr.msra.gmra.mrb[56].mxu1 %vm493_vm1, %v2300_v47 }
  0x8c   : > { %2005 = vmatprep.mubr.msk.bf16.mxu1 %vm493_vm1, %v2302_v48 }
  0x91   : > { %1912 = vmatmul.mubr.msk.bf16.gmra.mrb[52].mxu0 %vm493_vm1, %v2312_v51 }
  0x92   : > { %1356 = vmatprep.mubr.bf16.mxu0 %v2125_v3 }
  0x93   : > { %2006 = vmatmul.mubr.msk.bf16.gmra.mrb[60].mxu1 %vm493_vm1, %v2312_v51 }
  0x94   : > { %2009 = vmatprep.mubr.msk.bf16.mxu1 %vm493_vm1, %v2238_v19 }
  0x99   : > { %1913 = vmatmul.mubr.msk.bf16.gmra.mrb[56].mxu0 %vm493_vm1, %v2238_v19 }
  0x9a   : > { %1366 = vmatprep.mubr.bf16.mxu0 %v2125_v3 }
  0x9b   : > { %2010 = vmatmul.mubr.msk.bf16.gmra.mrb[64].mxu1 %vm493_vm1, %v2258_v24 }
  0x9c   : > { %2013 = vmatprep.mubr.msk.bf16.mxu1 %vm493_vm1, %v417_v56 }
  0xa1   : > { %1914 = vmatmul.mubr.msk.bf16.gmra.mrb[60].mxu0 %vm493_vm1, %v2258_v24 }
  0xa2   : > { %1376 = vmatprep.mubr.bf16.mxu0 %v2125_v3 }
  0xa3   : > { %2014 = vmatmul.mubr.msk.bf16.gmra.mrb[68].mxu1 %vm493_vm1, %v459_v61 }
  0xa9   : > { %1915 = vmatmul.mubr.msk.bf16.gmra.mrb[64].mxu0 %vm493_vm1, %v417_v56 }
  0xaa   : > { %1386 = vmatprep.mubr.bf16.mxu0 %v2125_v3 }
  0xb1   : > { %1916 = vmatmul.mubr.msk.bf16.gmra.mrb[68].mxu0 %vm493_vm1, %v459_v61 }
  0xed   : > { %v622_v62 = vpop.f32.mrb[0].mxu1 }
  0xee   : > { %v744_v63 = vrot.slane %v622_v62, 7  ;;  %v624_v0 = vpop.f32.mrb[1].mxu1 }
  0xef   : > { %v626_v1 = vpop.f32.mrb[2].mxu1 }
  0xf0   : > { %v752_v6 = vrot.slane %v626_v1, 7  ;;  %v628_v7 = vpop.f32.mrb[3].mxu1 }
  0xf2   : > { %v769_v8 = vsel %vm754_vm3, %v752_v6, %v744_v63  ;;  %v761_v3 = vsel %vm754_vm3, %v744_v63, %v752_v6 }
  0xf3   : > { %v783_v9 = vmul.f32 %v2416_v5, %v769_v8  ;;  %v2423_v10 = vadd.f32 %v761_v3, %v628_v7 }
  0xf5   : > { %v632_v11 = vpop.f32.mrb[4].mxu1  ;;  %v2425_v12 = vadd.f32 %v783_v9, %v624_v0 }
  0xf6   : > { %v745_v13 = vrot.slane %v632_v11, 7  ;;  %v634_v14 = vpop.f32.mrb[5].mxu1 }
  0xf7   : > { %v636_v15 = vpop.f32.mrb[6].mxu1 }
  0xf8   : > { %v753_v16 = vrot.slane %v636_v15, 7  ;;  %v638_v17 = vpop.f32.mrb[7].mxu1 }
  0xfa   : > { %v770_v18 = vsel %vm754_vm3, %v753_v16, %v745_v13  ;;  %v762_v19 = vsel %vm754_vm3, %v745_v13, %v753_v16 }
  0xfb   : > { %v785_v22 = vmul.f32 %v2416_v5, %v770_v18  ;;  %v2433_v23 = vadd.f32 %v762_v19, %v638_v17 }
  0xfc   : > { %v562_v21 = vpop.f32.mrb[0].mxu0 }
  0xfd   : > { %v564_v24 = vpop.f32.mrb[1].mxu0  ;;  %v2435_v27 = vadd.f32 %v785_v22, %v634_v14  ;;  %v738_v28 = vrot.slane %v562_v21, 7 }
  0xfe   : > { %v566_v25 = vpop.f32.mrb[2].mxu0  ;;  %v1967_v26 = vpop.f32.mrb[8].mxu1 }
  0xff   : > { %v746_v29 = vrot.slane %v566_v25, 7  ;;  %v568_v30 = vpop.f32.mrb[3].mxu0  ;;  %v788_v31 = vrot.slane %v1967_v26, 1  ;;  %v675_v32 = vpop.f32.mrb[9].mxu1 }
 0x100   : > { %v787_v33 = vrot.slane %v675_v32, 1  ;;  %v1968_v34 = vpop.f32.mrb[10].mxu1 }
 0x101   : > { %v763_v35 = vsel %vm754_vm3, %v746_v29, %v738_v28  ;;  %v755_v36 = vsel %vm754_vm3, %v738_v28, %v746_v29  ;;  %v796_v37 = vrot.slane %v1968_v34, 1  ;;  %v678_v38 = vpop.f32.mrb[11].mxu1 }
 0x102   : > { %v771_v39 = vmul.f32 %v2416_v5, %v763_v35  ;;  %v837_v40 = vadd.f32 %v755_v36, %v568_v30  ;;  %v795_v42 = vrot.slane %v678_v38, 1 }
 0x103   : > { %v805_v43 = vsel %vm803_vm5, %v788_v31, %v796_v37  ;;  %v813_v44 = vsel %vm803_vm5, %v796_v37, %v788_v31 }
 0x104   : > { %v572_v45 = vpop.f32.mrb[4].mxu0  ;;  %v804_v46 = vsel %vm803_vm5, %v787_v33, %v795_v42  ;;  %v812_v47 = vsel %vm803_vm5, %v795_v42, %v787_v33  ;;  %v836_v48 = vadd.f32 %v771_v39, %v564_v24  ;;  %v823_v0 = vmul.f32 %v2443_v41, %v813_v44 }
 0x105   : > { %v574_v49 = vpop.f32.mrb[5].mxu0  ;;  %v821_v50 = vmul.f32 %v2443_v41, %v812_v47  ;;  %v739_v54 = vrot.slane %v572_v45, 7 }
 0x106   : > { %v576_v51 = vpop.f32.mrb[6].mxu0  ;;  %v2454_v52 = vadd.f32 %v836_v48, %v804_v46  ;;  %v1971_v53 = vpop.f32.mrb[12].mxu1 }
 0x107   : > { %v747_v55 = vrot.slane %v576_v51, 7  ;;  %v578_v56 = vpop.f32.mrb[7].mxu0  ;;  %v2456_v57 = vadd.f32 %v837_v40, %v821_v50  ;;  %v790_v58 = vrot.slane %v1971_v53, 1  ;;  %v691_v59 = vpop.f32.mrb[13].mxu1 }
 0x108   : > { %v789_v60 = vrot.slane %v691_v59, 1  ;;  %v1972_v61 = vpop.f32.mrb[14].mxu1 }
 0x109   : > { %v764_v62 = vsel %vm754_vm3, %v747_v55, %v739_v54  ;;  %v756_v63 = vsel %vm754_vm3, %v739_v54, %v747_v55  ;;  %v798_v1 = vrot.slane %v1972_v61, 1  ;;  %v694_v2 = vpop.f32.mrb[15].mxu1 }
 0x10a   : > { %v773_v6 = vmul.f32 %v2416_v5, %v764_v62  ;;  %v839_v7 = vadd.f32 %v756_v63, %v578_v56  ;;  %v797_v8 = vrot.slane %v694_v2, 1 }
 0x10b   : > { %v2466_v3 = vsel %vm803_vm5, %v790_v58, %v798_v1  ;;  %v815_v9 = vsel %vm803_vm5, %v798_v1, %v790_v58 }
 0x10c   : > { %v838_v11 = vadd.f32 %v773_v6, %v574_v49  ;;  %v582_v13 = vpop.f32.mrb[8].mxu0  ;;  %v806_v14 = vsel %vm803_vm5, %v789_v60, %v797_v8  ;;  %v814_v15 = vsel %vm803_vm5, %v797_v8, %v789_v60  ;;  %v2474_v17 = vadd.f32 %v839_v7, %v823_v0 }
 0x10d   : > { %v584_v16 = vpop.f32.mrb[9].mxu0  ;;  %v740_v21 = vrot.slane %v582_v13, 7  ;;  %v825_v32 = vmul.f32 %v2443_v41, %v814_v15  ;;  %v827_v56 = vmul.f32 %v2443_v41, %v815_v9 }
 0x10e   : > { %v2476_v18 = vadd.f32 %v838_v11, %v805_v43  ;;  %v586_v19 = vpop.f32.mrb[10].mxu0  ;;  %v1975_v20 = vpop.f32.mrb[16].mxu1 }
 0x10f   : > { %v748_v22 = vrot.slane %v586_v19, 7  ;;  %v588_v24 = vpop.f32.mrb[11].mxu0  ;;  %v792_v25 = vrot.slane %v1975_v20, 1  ;;  %v707_v26 = vpop.f32.mrb[17].mxu1 }
 0x110   : > { %v791_v28 = vrot.slane %v707_v26, 1  ;;  %v1976_v29 = vpop.f32.mrb[18].mxu1 }
 0x111   : > { %v765_v30 = vsel %vm754_vm3, %v748_v22, %v740_v21  ;;  %v757_v31 = vsel %vm754_vm3, %v740_v21, %v748_v22  ;;  %v800_v33 = vrot.slane %v1976_v29, 1  ;;  %v710_v34 = vpop.f32.mrb[19].mxu1 }
 0x112   : > { %v775_v35 = vmul.f32 %v2416_v5, %v765_v30  ;;  %v841_v36 = vadd.f32 %v757_v31, %v588_v24  ;;  %v799_v37 = vrot.slane %v710_v34, 1 }
 0x113   : > { %v2486_v38 = vsel %vm803_vm5, %v792_v25, %v800_v33  ;;  %v2490_v39 = vsel %vm803_vm5, %v800_v33, %v792_v25 }
 0x114   : > { %v840_v40 = vadd.f32 %v775_v35, %v584_v16  ;;  %v592_v42 = vpop.f32.mrb[12].mxu0  ;;  %v808_v43 = vsel %vm803_vm5, %v791_v28, %v799_v37  ;;  %v816_v44 = vsel %vm803_vm5, %v799_v37, %v791_v28  ;;  %v2496_v46 = vadd.f32 %v841_v36, %v825_v32 }
 0x115   : > { %v594_v45 = vpop.f32.mrb[13].mxu0  ;;  %v741_v50 = vrot.slane %v592_v42, 7  ;;  %v829_v32 = vmul.f32 %v2443_v41, %v816_v44 }
 0x116   : > { %v2498_v47 = vadd.f32 %v840_v40, %v806_v14  ;;  %v596_v48 = vpop.f32.mrb[14].mxu0  ;;  %v1979_v49 = vpop.f32.mrb[20].mxu1 }
 0x117   : > { %v749_v51 = vrot.slane %v596_v48, 7  ;;  %v598_v53 = vpop.f32.mrb[15].mxu0  ;;  %v794_v54 = vrot.slane %v1979_v49, 1  ;;  %v723_v55 = vpop.f32.mrb[21].mxu1 }
 0x118   : > { %v1980_v58 = vpop.f32.mrb[22].mxu1  ;;  %v793_v61 = vrot.slane %v723_v55, 1 }
 0x119   : > { %v766_v59 = vsel %vm754_vm3, %v749_v51, %v741_v50  ;;  %v758_v60 = vsel %vm754_vm3, %v741_v50, %v749_v51  ;;  %v802_v62 = vrot.slane %v1980_v58, 1  ;;  %v726_v63 = vpop.f32.mrb[23].mxu1 }
 0x11a   : > { %v777_v0 = vmul.f32 %v2416_v5, %v766_v59  ;;  %v843_v1 = vadd.f32 %v758_v60, %v598_v53  ;;  %v801_v2 = vrot.slane %v726_v63, 1 }
 0x11b   : > { %v811_v6 = vsel %vm803_vm5, %v794_v54, %v802_v62  ;;  %v819_v7 = vsel %vm803_vm5, %v802_v62, %v794_v54 }
 0x11c   : > { %v842_v8 = vadd.f32 %v777_v0, %v594_v45  ;;  %v2510_v9 = vadd.f32 %v843_v1, %v827_v56  ;;  %v602_v11 = vpop.f32.mrb[16].mxu0  ;;  %v835_v13 = vmul.f32 %v2443_v41, %v819_v7  ;;  %v2514_v14 = vadd.f32 %v2435_v27, %v811_v6 }
 0x11d   : > { %v604_v15 = vpop.f32.mrb[17].mxu0  ;;  %v810_v16 = vsel %vm803_vm5, %v793_v61, %v801_v2  ;;  %v818_v19 = vsel %vm803_vm5, %v801_v2, %v793_v61  ;;  %v742_v26 = vrot.slane %v602_v11, 7  ;;  %v831_v6 = vmul.f32 %v2443_v41, %v2490_v39 }
 0x11e   : > { %v2521_v20 = vadd.f32 %v842_v8, %v2466_v3  ;;  %v606_v21 = vpop.f32.mrb[18].mxu0  ;;  %v833_v22 = vmul.f32 %v2443_v41, %v818_v19  ;;  %v2525_v24 = vadd.f32 %v2425_v12, %v810_v16  ;;  %v933_v25 = vpop.f32.mrb[24].mxu1  ;;  %v2528_v27 = vadd.f32 %v2433_v23, %v835_v13 }
 0x11f   : > { %v750_v28 = vrot.slane %v606_v21, 7  ;;  %v608_v29 = vpop.f32.mrb[19].mxu0  ;;  %v1109_v30 = vrot.slane %v933_v25, 7  ;;  %v935_v31 = vpop.f32.mrb[25].mxu1 }
 0x120   : > { %v937_v33 = vpop.f32.mrb[26].mxu1  ;;  %v2532_v3 = vadd.f32 %v2423_v10, %v833_v22 }
 0x121   : > { %v767_v34 = vsel %vm754_vm3, %v750_v28, %v742_v26  ;;  %v759_v12 = vsel %vm754_vm3, %v742_v26, %v750_v28  ;;  %v1117_v35 = vrot.slane %v937_v33, 7  ;;  %v939_v23 = vpop.f32.mrb[27].mxu1 }
 0x122   : > { %v779_v36 = vmul.f32 %v2416_v5, %v767_v34  ;;  %v845_v37 = vadd.f32 %v759_v12, %v608_v29 }
 0x123   : > { %v1133_v40 = vsel %vm754_vm3, %v1117_v35, %v1109_v30  ;;  %v1125_v42 = vsel %vm754_vm3, %v1109_v30, %v1117_v35 }
 0x124   : > { %v844_v44 = vadd.f32 %v779_v36, %v604_v15  ;;  %v2543_v10 = vadd.f32 %v845_v37, %v829_v32  ;;  %v612_v45 = vpop.f32.mrb[20].mxu0  ;;  %v1141_v48 = vmul.f32 %v2416_v5, %v1133_v40  ;;  %v1206_v49 = vadd.f32 %v1125_v42, %v939_v23 }
 0x125   : > { %v614_v50 = vpop.f32.mrb[21].mxu0  ;;  %v743_v56 = vrot.slane %v612_v45, 7 }
 0x126   : > { %v2546_v51 = vadd.f32 %v844_v44, %v808_v43  ;;  %v616_v53 = vpop.f32.mrb[22].mxu0  ;;  %v1205_v54 = vadd.f32 %v1141_v48, %v935_v31  ;;  %v943_v55 = vpop.f32.mrb[28].mxu1 }
 0x127   : > { %v751_v58 = vrot.slane %v616_v53, 7  ;;  %v618_v59 = vpop.f32.mrb[23].mxu0  ;;  %v1110_v60 = vrot.slane %v943_v55, 7  ;;  %v945_v61 = vpop.f32.mrb[29].mxu1 }
 0x128   : > { %v947_v62 = vpop.f32.mrb[30].mxu1 }
 0x129   : > { %v768_v63 = vsel %vm754_vm3, %v751_v58, %v743_v56  ;;  %v760_v0 = vsel %vm754_vm3, %v743_v56, %v751_v58  ;;  %v1118_v1 = vrot.slane %v947_v62, 7  ;;  %v949_v2 = vpop.f32.mrb[31].mxu1 }
 0x12a   : > { %v781_v43 = vmul.f32 %v2416_v5, %v768_v63  ;;  %v847_v7 = vadd.f32 %v760_v0, %v618_v59 }
 0x12b   : > { %v1134_v8 = vsel %vm754_vm3, %v1118_v1, %v1110_v60  ;;  %v1126_v11 = vsel %vm754_vm3, %v1110_v60, %v1118_v1 }
 0x12c   : > { %v846_v13 = vadd.f32 %v781_v43, %v614_v50  ;;  %v2559_v15 = vadd.f32 %v847_v7, %v831_v6  ;;  %v1985_v16 = vpop.f32.mrb[24].mxu0  ;;  %v1143_v19 = vmul.f32 %v2416_v5, %v1134_v8  ;;  %v1208_v21 = vadd.f32 %v1126_v11, %v949_v2 }
 0x12d   : > { %v1046_v22 = vpop.f32.mrb[25].mxu0  ;;  %v1158_v29 = vrot.slane %v1985_v16, 1 }
 0x12e   : > { %v2563_v25 = vadd.f32 %v846_v13, %v2486_v38  ;;  %v1986_v26 = vpop.f32.mrb[26].mxu0  ;;  %v1207_v39 = vadd.f32 %v1143_v19, %v945_v61  ;;  %v953_v28 = vpop.f32.mrb[32].mxu1  ;;  %v1157_v34 = vrot.slane %v1046_v22, 1 }
 0x12f   : > { %v1166_v30 = vrot.slane %v1986_v26, 1  ;;  %v1049_v31 = vpop.f32.mrb[27].mxu0  ;;  %v1111_v32 = vrot.slane %v953_v28, 7  ;;  %v955_v33 = vpop.f32.mrb[33].mxu1 }
 0x130   : > { %v1165_v12 = vrot.slane %v1049_v31, 1  ;;  %v957_v35 = vpop.f32.mrb[34].mxu1 }
 0x131   : > { %v1174_v23 = vsel %vm803_vm5, %v1158_v29, %v1166_v30  ;;  %v1182_v36 = vsel %vm803_vm5, %v1166_v30, %v1158_v29  ;;  %v1119_v37 = vrot.slane %v957_v35, 7  ;;  %v959_v38 = vpop.f32.mrb[35].mxu1 }
 0x132   : > { %v1173_v40 = vsel %vm803_vm5, %v1157_v34, %v1165_v12  ;;  %v1181_v42 = vsel %vm803_vm5, %v1165_v12, %v1157_v34  ;;  %v1223_v44 = vadd.f32 %v1207_v39, %v1174_v23  ;;  %v1192_v45 = vmul.f32 %v2443_v41, %v1182_v36 }
 0x133   : > { %v1190_v48 = vmul.f32 %v2443_v41, %v1181_v42  ;;  %v1221_v50 = vadd.f32 %v1205_v54, %v1173_v40  ;;  %v1135_v53 = vsel %vm754_vm3, %v1119_v37, %v1111_v32  ;;  %v1127_v55 = vsel %vm754_vm3, %v1111_v32, %v1119_v37 }
 0x134   : > { %v1989_v56 = vpop.f32.mrb[28].mxu0  ;;  %v1224_v58 = vadd.f32 %v1208_v21, %v1192_v45  ;;  %v1145_v59 = vmul.f32 %v2416_v5, %v1135_v53  ;;  %v1210_v60 = vadd.f32 %v1127_v55, %v959_v38  ;;  %v2581_v61 = vadd.f32 %v1223_v44, %v2476_v18 }
 0x135   : > { %v1222_v62 = vadd.f32 %v1206_v49, %v1190_v48  ;;  %v2584_v63 = vadd.f32 %v1221_v50, %v2454_v52  ;;  %v1062_v0 = vpop.f32.mrb[29].mxu0  ;;  %v1160_v7 = vrot.slane %v1989_v56, 1 }
 0x136   : > { %v2587_v54 = vadd.f32 %v1224_v58, %v2474_v17  ;;  %v1990_v1 = vpop.f32.mrb[30].mxu0  ;;  %v1209_v2 = vadd.f32 %v1145_v59, %v955_v33  ;;  %v963_v43 = vpop.f32.mrb[36].mxu1  ;;  %v1159_v16 = vrot.slane %v1062_v0, 1 }
 0x137   : > { %v2590_v6 = vadd.f32 %v1222_v62, %v2456_v57  ;;  %v1168_v8 = vrot.slane %v1990_v1, 1  ;;  %v1065_v11 = vpop.f32.mrb[31].mxu0  ;;  %v1112_v13 = vrot.slane %v963_v43, 7  ;;  %v965_v18 = vpop.f32.mrb[37].mxu1 }
 0x138   : > { %v1167_v49 = vrot.slane %v1065_v11, 1  ;;  %v967_v19 = vpop.f32.mrb[38].mxu1 }
 0x139   : > { %v1176_v52 = vsel %vm803_vm5, %v1160_v7, %v1168_v8  ;;  %v1184_v17 = vsel %vm803_vm5, %v1168_v8, %v1160_v7  ;;  %v1120_v21 = vrot.slane %v967_v19, 7  ;;  %v969_v22 = vpop.f32.mrb[39].mxu1 }
 0x13a   : > { %v1175_v57 = vsel %vm803_vm5, %v1159_v16, %v1167_v49  ;;  %v1183_v26 = vsel %vm803_vm5, %v1167_v49, %v1159_v16  ;;  %v1196_v33 = vmul.f32 %v2443_v41, %v1184_v17 }
 0x13b   : > { %v1225_v39 = vadd.f32 %v1209_v2, %v1175_v57  ;;  %v1194_v28 = vmul.f32 %v2443_v41, %v1183_v26  ;;  %v1136_v29 = vsel %vm754_vm3, %v1120_v21, %v1112_v13  ;;  %v1128_v30 = vsel %vm754_vm3, %v1112_v13, %v1120_v21 }
 0x13c   : > { %v1993_v31 = vpop.f32.mrb[32].mxu0  ;;  %v1147_v32 = vmul.f32 %v2416_v5, %v1136_v29  ;;  %v1212_v34 = vadd.f32 %v1128_v30, %v969_v22 }
 0x13d   : > { %v1226_v12 = vadd.f32 %v1210_v60, %v1194_v28  ;;  %v1078_v35 = vpop.f32.mrb[33].mxu0  ;;  %v2608_v23 = vadd.f32 %v1225_v39, %v2498_v47  ;;  %v1162_v42 = vrot.slane %v1993_v31, 1 }
 0x13e   : > { %v1994_v36 = vpop.f32.mrb[34].mxu0  ;;  %v1211_v37 = vadd.f32 %v1147_v32, %v965_v18  ;;  %v1228_v38 = vadd.f32 %v1212_v34, %v1196_v33  ;;  %v973_v40 = vpop.f32.mrb[40].mxu1  ;;  %v1161_v55 = vrot.slane %v1078_v35, 1 }
 0x13f   : > { %v2611_v44 = vadd.f32 %v1226_v12, %v2496_v46  ;;  %v1170_v45 = vrot.slane %v1994_v36, 1  ;;  %v1081_v48 = vpop.f32.mrb[35].mxu0  ;;  %v1113_v50 = vrot.slane %v973_v40, 7  ;;  %v975_v53 = vpop.f32.mrb[41].mxu1 }
 0x140   : > { %v1169_v56 = vrot.slane %v1081_v48, 1  ;;  %v1227_v58 = vadd.f32 %v1211_v37, %v1176_v52  ;;  %v2614_v59 = vadd.f32 %v1228_v38, %v2510_v9  ;;  %v977_v47 = vpop.f32.mrb[42].mxu1 }
 0x141   : > { %v1178_v60 = vsel %vm803_vm5, %v1162_v42, %v1170_v45  ;;  %v1186_v62 = vsel %vm803_vm5, %v1170_v45, %v1162_v42  ;;  %v1121_v0 = vrot.slane %v977_v47, 7  ;;  %v979_v46 = vpop.f32.mrb[43].mxu1 }
 0x142   : > { %v1177_v1 = vsel %vm803_vm5, %v1161_v55, %v1169_v56  ;;  %v1185_v2 = vsel %vm803_vm5, %v1169_v56, %v1161_v55  ;;  %v2625_v43 = vadd.f32 %v1227_v58, %v2521_v20  ;;  %v1200_v45 = vmul.f32 %v2443_v41, %v1186_v62 }
 0x143   : > { %v1137_v9 = vsel %vm754_vm3, %v1121_v0, %v1113_v50  ;;  %v1129_v7 = vsel %vm754_vm3, %v1113_v50, %v1121_v0  ;;  %v1198_v13 = vmul.f32 %v2443_v41, %v1185_v2 }
 0x144   : > { %v1997_v8 = vpop.f32.mrb[36].mxu0  ;;  %v1149_v11 = vmul.f32 %v2416_v5, %v1137_v9  ;;  %v1214_v18 = vadd.f32 %v1129_v7, %v979_v46 }
 0x145   : > { %v1094_v16 = vpop.f32.mrb[37].mxu0  ;;  %v1164_v21 = vrot.slane %v1997_v8, 1 }
 0x146   : > { %v1998_v49 = vpop.f32.mrb[38].mxu0  ;;  %v1213_v19 = vadd.f32 %v1149_v11, %v975_v53  ;;  %v1230_v52 = vadd.f32 %v1214_v18, %v1198_v13  ;;  %v983_v17 = vpop.f32.mrb[44].mxu1  ;;  %v1163_v39 = vrot.slane %v1094_v16, 1 }
 0x147   : > { %v1172_v20 = vrot.slane %v1998_v49, 1  ;;  %v1097_v22 = vpop.f32.mrb[39].mxu0  ;;  %v1114_v57 = vrot.slane %v983_v17, 7  ;;  %v985_v26 = vpop.f32.mrb[45].mxu1 }
 0x148   : > { %v1171_v28 = vrot.slane %v1097_v22, 1  ;;  %v1229_v29 = vadd.f32 %v1213_v19, %v1177_v1  ;;  %v2634_v30 = vadd.f32 %v1230_v52, %v2543_v10  ;;  %v987_v31 = vpop.f32.mrb[46].mxu1 }
 0x149   : > { %v2638_v32 = vsel %vm803_vm5, %v1164_v21, %v1172_v20  ;;  %v2642_v33 = vsel %vm803_vm5, %v1172_v20, %v1164_v21  ;;  %v1122_v34 = vrot.slane %v987_v31, 7  ;;  %v989_v12 = vpop.f32.mrb[47].mxu1 }
 0x14a   : > { %v1179_v35 = vsel %vm803_vm5, %v1163_v39, %v1171_v28  ;;  %v1187_v36 = vsel %vm803_vm5, %v1171_v28, %v1163_v39  ;;  %v2649_v10 = vadd.f32 %v1229_v29, %v2546_v51 }
 0x14b   : > { %v1138_v37 = vsel %vm754_vm3, %v1122_v34, %v1114_v57  ;;  %v1130_v38 = vsel %vm754_vm3, %v1114_v57, %v1122_v34  ;;  %v1202_v17 = vmul.f32 %v2443_v41, %v1187_v36 }
 0x14c   : > { %v1318_v40 = vpop.f32.mrb[40].mxu0  ;;  %v1151_v42 = vmul.f32 %v2416_v5, %v1138_v37  ;;  %v1216_v48 = vadd.f32 %v1130_v38, %v989_v12 }
 0x14d   : > { %v1320_v50 = vpop.f32.mrb[41].mxu0  ;;  %v1494_v47 = vrot.slane %v1318_v40, 7 }
 0x14e   : > { %v1322_v53 = vpop.f32.mrb[42].mxu0  ;;  %v1215_v55 = vadd.f32 %v1151_v42, %v985_v26  ;;  %v1232_v56 = vadd.f32 %v1216_v48, %v1200_v45  ;;  %v993_v58 = vpop.f32.mrb[48].mxu1 }
 0x14f   : > { %v1502_v51 = vrot.slane %v1322_v53, 7  ;;  %v1324_v0 = vpop.f32.mrb[43].mxu0  ;;  %v1115_v46 = vrot.slane %v993_v58, 7  ;;  %v995_v1 = vpop.f32.mrb[49].mxu1 }
 0x150   : > { %v1231_v2 = vadd.f32 %v1215_v55, %v1178_v60  ;;  %v2658_v9 = vadd.f32 %v1232_v56, %v2559_v15  ;;  %v997_v7 = vpop.f32.mrb[50].mxu1 }
 0x151   : > { %v1518_v8 = vsel %vm754_vm3, %v1502_v51, %v1494_v47  ;;  %v1510_v62 = vsel %vm754_vm3, %v1494_v47, %v1502_v51  ;;  %v1123_v11 = vrot.slane %v997_v7, 7  ;;  %v999_v13 = vpop.f32.mrb[51].mxu1  ;;  %v1204_v47 = vmul.f32 %v2443_v41, %v2642_v33 }
 0x152   : > { %v1526_v18 = vmul.f32 %v2416_v5, %v1518_v8  ;;  %v2665_v16 = vadd.f32 %v1510_v62, %v1324_v0  ;;  %v2668_v49 = vadd.f32 %v1231_v2, %v2563_v25 }
 0x153   : > { %v1139_v15 = vsel %vm754_vm3, %v1123_v11, %v1115_v46  ;;  %v1131_v60 = vsel %vm754_vm3, %v1115_v46, %v1123_v11 }
 0x154   : > { %v1328_v19 = vpop.f32.mrb[44].mxu0  ;;  %v1153_v52 = vmul.f32 %v2416_v5, %v1139_v15  ;;  %v1218_v21 = vadd.f32 %v1131_v60, %v999_v13  ;;  %v1590_v20 = vadd.f32 %v1526_v18, %v1320_v50 }
 0x155   : > { %v1330_v22 = vpop.f32.mrb[45].mxu0  ;;  %v1495_v25 = vrot.slane %v1328_v19, 7 }
 0x156   : > { %v1332_v57 = vpop.f32.mrb[46].mxu0  ;;  %v1217_v26 = vadd.f32 %v1153_v52, %v995_v1  ;;  %v1234_v39 = vadd.f32 %v1218_v21, %v1202_v17  ;;  %v1003_v28 = vpop.f32.mrb[52].mxu1 }
 0x157   : > { %v1503_v29 = vrot.slane %v1332_v57, 7  ;;  %v1334_v31 = vpop.f32.mrb[47].mxu0  ;;  %v1116_v34 = vrot.slane %v1003_v28, 7  ;;  %v1005_v12 = vpop.f32.mrb[53].mxu1 }
 0x158   : > { %v1233_v37 = vadd.f32 %v1217_v26, %v1179_v35  ;;  %v2677_v38 = vadd.f32 %v1234_v39, %v2532_v3  ;;  %v1007_v40 = vpop.f32.mrb[54].mxu1 }
 0x159   : > { %v1519_v36 = vsel %vm754_vm3, %v1503_v29, %v1495_v25  ;;  %v1511_v42 = vsel %vm754_vm3, %v1495_v25, %v1503_v29  ;;  %v1124_v45 = vrot.slane %v1007_v40, 7  ;;  %v1009_v48 = vpop.f32.mrb[55].mxu1 }
 0x15a   : > { %v1528_v50 = vmul.f32 %v2416_v5, %v1519_v36  ;;  %v1593_v53 = vadd.f32 %v1511_v42, %v1334_v31  ;;  %v2685_v55 = vadd.f32 %v1233_v37, %v2525_v24 }
 0x15b   : > { %v1140_v35 = vsel %vm754_vm3, %v1124_v45, %v1116_v34  ;;  %v1132_v3 = vsel %vm754_vm3, %v1116_v34, %v1124_v45 }
 0x15c   : > { %v1338_v56 = vpop.f32.mrb[48].mxu0  ;;  %v1155_v58 = vmul.f32 %v2416_v5, %v1140_v35  ;;  %v1220_v51 = vadd.f32 %v1132_v3, %v1009_v48  ;;  %v1592_v0 = vadd.f32 %v1528_v50, %v1330_v22 }
 0x15d   : > { %v1340_v46 = vpop.f32.mrb[49].mxu0  ;;  %v1496_v8 = vrot.slane %v1338_v56, 7 }
 0x15e   : > { %v1342_v1 = vpop.f32.mrb[50].mxu0  ;;  %v1219_v2 = vadd.f32 %v1155_v58, %v1005_v12  ;;  %v1236_v7 = vadd.f32 %v1220_v51, %v1204_v47  ;;  %v2003_v24 = vpop.f32.mrb[56].mxu1  ;;  %v2722_v58 = vld [vmem:[%s2886_s4] ss:$0 sm:$0xff] }
 0x15f   : > { %v1504_v62 = vrot.slane %v1342_v1, 7  ;;  %v1344_v11 = vpop.f32.mrb[51].mxu0  ;;  %v1543_v13 = vrot.slane %v2003_v24, 1  ;;  %v1431_v18 = vpop.f32.mrb[57].mxu1 }
 0x160   : > { %v1235_v15 = vadd.f32 %v1219_v2, %v2638_v32  ;;  %v2696_v60 = vadd.f32 %v1236_v7, %v2528_v27  ;;  %v1542_v19 = vrot.slane %v1431_v18, 1  ;;  %v2004_v52 = vpop.f32.mrb[58].mxu1 }
 0x161   : > { %v1520_v33 = vsel %vm754_vm3, %v1504_v62, %v1496_v8  ;;  %v1512_v17 = vsel %vm754_vm3, %v1496_v8, %v1504_v62  ;;  %v1551_v21 = vrot.slane %v2004_v52, 1  ;;  %v1434_v22 = vpop.f32.mrb[59].mxu1 }
 0x162   : > { %v1530_v57 = vmul.f32 %v2416_v5, %v1520_v33  ;;  %v2703_v26 = vadd.f32 %v1512_v17, %v1344_v11  ;;  %v2706_v39 = vadd.f32 %v1235_v15, %v2514_v14  ;;  %v1550_v32 = vrot.slane %v1434_v22, 1 }
 0x163   : > { %v1559_v27 = vsel %vm803_vm5, %v1543_v13, %v1551_v21  ;;  %v1567_v28 = vsel %vm803_vm5, %v1551_v21, %v1543_v13  ;;  %v2070_v13 = vld [vmem:[%s2227_s13 + $0x18] sm:$0xff] }
 0x164   : > { %v1348_v25 = vpop.f32.mrb[52].mxu0  ;;  %v1577_v29 = vmul.f32 %v2443_v41, %v1567_v28  ;;  %v1608_v31 = vadd.f32 %v1592_v0, %v1559_v27  ;;  %v1558_v34 = vsel %vm803_vm5, %v1542_v19, %v1550_v32  ;;  %v1566_v12 = vsel %vm803_vm5, %v1550_v32, %v1542_v19  ;;  %v2071_v19 = vld [vmem:[%s2227_s13 + $0x8] sm:$0xff] }
 0x165   : > { %v1350_v37 = vpop.f32.mrb[53].mxu0  ;;  %v1575_v14 = vmul.f32 %v2443_v41, %v1566_v12  ;;  %v1606_v40 = vadd.f32 %v1590_v20, %v1558_v34  ;;  %v1594_v36 = vadd.f32 %v1530_v57, %v1340_v46  ;;  %v1497_v35 = vrot.slane %v1348_v25, 7 }
 0x166   : > { %v1352_v42 = vpop.f32.mrb[54].mxu0  ;;  %v1609_v45 = vadd.f32 %v1593_v53, %v1577_v29  ;;  %v1624_v48 = vadd.f32 %v1608_v31, %v2581_v61  ;;  %v2007_v50 = vpop.f32.mrb[60].mxu1  ;;  %v2068_v61 = vld [vmem:[%s2227_s13 + $0x10] sm:$0xff] }
 0x167   : > { %v1505_v3 = vrot.slane %v1352_v42, 7  ;;  %v1354_v56 = vpop.f32.mrb[55].mxu0  ;;  %v1607_v47 = vadd.f32 %v2665_v16, %v1575_v14  ;;  %v1622_v20 = vadd.f32 %v1606_v40, %v2584_v63  ;;  %v1447_v51 = vpop.f32.mrb[61].mxu1  ;;  %v1545_v46 = vrot.slane %v2007_v50, 1 }
 0x168   : > { %v1625_v53 = vadd.f32 %v1609_v45, %v2587_v54  ;;  %v1640_v0 = vadd.f32 %v2068_v61, %v1624_v48  ;;  %v1544_v1 = vrot.slane %v1447_v51, 1  ;;  %v2008_v2 = vpop.f32.mrb[62].mxu1  ;;  %v2069_v54 = vld [vmem:[%s2227_s13] sm:$0xff] }
 0x169   : > { %v1521_v7 = vsel %vm754_vm3, %v1505_v3, %v1497_v35  ;;  %v1513_v24 = vsel %vm754_vm3, %v1497_v35, %v1505_v3  ;;  %v1623_v63 = vadd.f32 %v1607_v47, %v2590_v6  ;;  %v1638_v16 = vadd.f32 %v2069_v54, %v1622_v20  ;;  %v1450_v8 = vpop.f32.mrb[63].mxu1  ;;  %v2073_v54 = vld [vmem:[%s2227_s13 + $0x20] sm:$0xff] }
 0x16a   : > { %v1532_v62 = vmul.f32 %v2416_v5, %v1521_v7  ;;  %v1597_v11 = vadd.f32 %v1513_v24, %v1354_v56  ;;  %v1641_v18 = vadd.f32 %v2070_v13, %v1625_v53  ;;  %v1663_v15 = vadd.f32 %v2722_v58, %v1640_v0  ;;  %v2072_v7 = vld [vmem:[%s2227_s13 + $0x30] sm:$0xff] }
 0x16b   : > { %v1639_v52 = vadd.f32 %v2071_v19, %v1623_v63  ;;  %v1661_v33 = vadd.f32 %v2722_v58, %v1638_v16  ;;  %v1553_v17 = vrot.slane %v2008_v2, 1  ;;  %v1552_v21 = vrot.slane %v1450_v8, 1 }
 0x16c   : > { %v1664_v6 = vadd.f32 %v2722_v58, %v1641_v18  ;;  %1679 = vst.msk [vmem:[%s2737_s30 + $0x10] sm:$0xff] %vm493_vm1, %v1663_v15  ;;  %v1358_v22 = vpop.f32.mrb[56].mxu0  ;;  %v1596_v57 = vadd.f32 %v1532_v62, %v1350_v37  ;;  %v2075_v15 = vld [vmem:[%s2227_s13 + $0x28] sm:$0xff] }
 0x16d   : > { %v1662_v32 = vadd.f32 %v2722_v58, %v1639_v52  ;;  %1677 = vst.msk [vmem:[%s2737_s30] sm:$0xff] %vm493_vm1, %v1661_v33  ;;  %v1360_v27 = vpop.f32.mrb[57].mxu0  ;;  %v1561_v28 = vsel %vm803_vm5, %v1545_v46, %v1553_v17  ;;  %v1569_v25 = vsel %vm803_vm5, %v1553_v17, %v1545_v46  ;;  %v1560_v12 = vsel %vm803_vm5, %v1544_v1, %v1552_v21 }
 0x16e   : > { %1680 = vst.msk [vmem:[%s2737_s30 + $0x18] sm:$0xff] %vm493_vm1, %v1664_v6  ;;  %v1362_v29 = vpop.f32.mrb[58].mxu0  ;;  %v1581_v31 = vmul.f32 %v2443_v41, %v1569_v25  ;;  %v1612_v34 = vadd.f32 %v1596_v57, %v1561_v28  ;;  %v1568_v37 = vsel %vm803_vm5, %v1552_v21, %v1544_v1  ;;  %v2011_v14 = vpop.f32.mrb[64].mxu1  ;;  %v1498_v40 = vrot.slane %v1358_v22, 7 }
 0x16f   : > { %1678 = vst.msk [vmem:[%s2737_s30 + $0x8] sm:$0xff] %vm493_vm1, %v1662_v32  ;;  %v1506_v42 = vrot.slane %v1362_v29, 7  ;;  %v1364_v45 = vpop.f32.mrb[59].mxu0  ;;  %v1579_v48 = vmul.f32 %v2443_v41, %v1568_v37  ;;  %v1610_v50 = vadd.f32 %v1594_v36, %v1560_v12  ;;  %v1463_v35 = vpop.f32.mrb[65].mxu1  ;;  %v1547_v47 = vrot.slane %v2011_v14, 1 }
 0x170   : > { %v1613_v3 = vadd.f32 %v1597_v11, %v1581_v31  ;;  %v1628_v56 = vadd.f32 %v1612_v34, %v2625_v43  ;;  %v1546_v20 = vrot.slane %v1463_v35, 1  ;;  %v2012_v51 = vpop.f32.mrb[66].mxu1  ;;  %v2074_v11 = vld [vmem:[%s2227_s13 + $0x38] sm:$0xff] }
 0x171   : > { %v1522_v53 = vsel %vm754_vm3, %v1506_v42, %v1498_v40  ;;  %v1514_v61 = vsel %vm754_vm3, %v1498_v40, %v1506_v42  ;;  %v1611_v0 = vadd.f32 %v2703_v26, %v1579_v48  ;;  %v1626_v46 = vadd.f32 %v1610_v50, %v2608_v23  ;;  %v1466_v36 = vpop.f32.mrb[67].mxu1 }
 0x172   : > { %v1534_v1 = vmul.f32 %v2416_v5, %v1522_v53  ;;  %v1599_v2 = vadd.f32 %v1514_v61, %v1364_v45  ;;  %v1629_v43 = vadd.f32 %v1613_v3, %v2614_v59  ;;  %v1644_v24 = vadd.f32 %v2072_v7, %v1628_v56 }
 0x173   : > { %v1627_v63 = vadd.f32 %v1611_v0, %v2611_v44  ;;  %v1642_v16 = vadd.f32 %v2073_v54, %v1626_v46  ;;  %v1555_v8 = vrot.slane %v2012_v51, 1  ;;  %v1554_v62 = vrot.slane %v1466_v36, 1  ;;  %v2076_v36 = vld [vmem:[%s2227_s13 + $0x40] sm:$0xff] }
 0x174   : > { %v1645_v26 = vadd.f32 %v2074_v11, %v1629_v43  ;;  %v1667_v23 = vadd.f32 %v2722_v58, %v1644_v24  ;;  %v1368_v13 = vpop.f32.mrb[60].mxu0  ;;  %v1598_v18 = vadd.f32 %v1534_v1, %v1360_v27 }
 0x175   : > { %v1643_v19 = vadd.f32 %v2075_v15, %v1627_v63  ;;  %v1665_v59 = vadd.f32 %v2722_v58, %v1642_v16  ;;  %v1370_v52 = vpop.f32.mrb[61].mxu0  ;;  %v1563_v44 = vsel %vm803_vm5, %v1547_v47, %v1555_v8  ;;  %v1571_v21 = vsel %vm803_vm5, %v1555_v8, %v1547_v47 }
 0x176   : > { %v1668_v33 = vadd.f32 %v2722_v58, %v1645_v26  ;;  %1683 = vst.msk [vmem:[%s2737_s30 + $0x30] sm:$0xff] %vm493_vm1, %v1667_v23  ;;  %v1372_v17 = vpop.f32.mrb[62].mxu0  ;;  %v1562_v6 = vsel %vm803_vm5, %v1546_v20, %v1554_v62  ;;  %v1570_v22 = vsel %vm803_vm5, %v1554_v62, %v1546_v20  ;;  %v2015_v57 = vpop.f32.mrb[68].mxu1  ;;  %v1499_v27 = vrot.slane %v1368_v13, 7 }
 0x177   : > { %v1666_v32 = vadd.f32 %v2722_v58, %v1643_v19  ;;  %1681 = vst.msk [vmem:[%s2737_s30 + $0x20] sm:$0xff] %vm493_vm1, %v1665_v59  ;;  %v1507_v28 = vrot.slane %v1372_v17, 7  ;;  %v1374_v25 = vpop.f32.mrb[63].mxu0  ;;  %v1583_v29 = vmul.f32 %v2443_v41, %v1570_v22  ;;  %v1479_v31 = vpop.f32.mrb[69].mxu1  ;;  %v1585_v34 = vmul.f32 %v2443_v41, %v1571_v21 }
 0x178   : > { %1684 = vst.msk [vmem:[%s2737_s30 + $0x38] sm:$0xff] %vm493_vm1, %v1668_v33  ;;  %v1614_v12 = vadd.f32 %v1598_v18, %v1562_v6  ;;  %v1549_v37 = vrot.slane %v2015_v57, 1  ;;  %v1548_v14 = vrot.slane %v1479_v31, 1  ;;  %v2016_v40 = vpop.f32.mrb[70].mxu1  ;;  %v2078_v18 = vld [vmem:[%s2227_s13 + $0x58] sm:$0xff] }
 0x179   : > { %1682 = vst.msk [vmem:[%s2737_s30 + $0x28] sm:$0xff] %vm493_vm1, %v1666_v32  ;;  %v1523_v42 = vsel %vm754_vm3, %v1507_v28, %v1499_v27  ;;  %v1515_v45 = vsel %vm754_vm3, %v1499_v27, %v1507_v28  ;;  %v1615_v48 = vadd.f32 %v1599_v2, %v1583_v29  ;;  %v1557_v50 = vrot.slane %v2016_v40, 1  ;;  %v1482_v35 = vpop.f32.mrb[71].mxu1 }
 0x17a   : > { %v1536_v3 = vmul.f32 %v2416_v5, %v1523_v42  ;;  %v1601_v56 = vadd.f32 %v1515_v45, %v1374_v25  ;;  %v1630_v47 = vadd.f32 %v1614_v12, %v2649_v10  ;;  %v1556_v20 = vrot.slane %v1482_v35, 1  ;;  %v2077_v10 = vld [vmem:[%s2227_s13 + $0x48] sm:$0xff] }
 0x17b   : > { %v1631_v51 = vadd.f32 %v1615_v48, %v2634_v30  ;;  %v1565_v53 = vsel %vm803_vm5, %v1549_v37, %v1557_v50  ;;  %v1573_v61 = vsel %vm803_vm5, %v1557_v50, %v1549_v37  ;;  %v2080_v37 = vld [vmem:[%s2227_s13 + $0x68] sm:$0xff] }
 0x17c   : > { %v1600_v0 = vadd.f32 %v1536_v3, %v1370_v52  ;;  %v1617_v46 = vadd.f32 %v1601_v56, %v1585_v34  ;;  %v1646_v1 = vadd.f32 %v2076_v36, %v1630_v47  ;;  %v1378_v2 = vpop.f32.mrb[64].mxu0  ;;  %v1564_v43 = vsel %vm803_vm5, %v1548_v14, %v1556_v20  ;;  %v2079_v52 = vld [vmem:[%s2227_s13 + $0x50] sm:$0xff] }
 0x17d   : > { %v1647_v7 = vadd.f32 %v2077_v10, %v1631_v51  ;;  %v1380_v30 = vpop.f32.mrb[65].mxu0  ;;  %v1572_v24 = vsel %vm803_vm5, %v1556_v20, %v1548_v14  ;;  %v1500_v11 = vrot.slane %v1378_v2, 7  ;;  %v1589_v40 = vmul.f32 %v2443_v41, %v1573_v61  ;;  %v2082_v51 = vld [vmem:[%s2227_s13 + $0x78] sm:$0xff] }
 0x17e   : > { %v1616_v63 = vadd.f32 %v1600_v0, %v1563_v44  ;;  %v1633_v54 = vadd.f32 %v1617_v46, %v2658_v9  ;;  %v1669_v16 = vadd.f32 %v2722_v58, %v1646_v1  ;;  %v1382_v8 = vpop.f32.mrb[66].mxu0  ;;  %v1587_v19 = vmul.f32 %v2443_v41, %v1572_v24  ;;  %v2083_v0 = vld [vmem:[%s2227_s13 + $0x70] sm:$0xff] }
 0x17f   : > { %v1670_v62 = vadd.f32 %v2722_v58, %v1647_v7  ;;  %v1508_v26 = vrot.slane %v1382_v8, 7  ;;  %v1384_v23 = vpop.f32.mrb[67].mxu0 }
 0x180   : > { %v1632_v13 = vadd.f32 %v1616_v63, %v2668_v49  ;;  %v1649_v15 = vadd.f32 %v2078_v18, %v1633_v54  ;;  %1685 = vst.msk [vmem:[%s2737_s30 + $0x40] sm:$0xff] %vm493_vm1, %v1669_v16 }
 0x181   : > { %1686 = vst.msk [vmem:[%s2737_s30 + $0x48] sm:$0xff] %vm493_vm1, %v1670_v62  ;;  %v1524_v9 = vsel %vm754_vm3, %v1508_v26, %v1500_v11  ;;  %v1516_v59 = vsel %vm754_vm3, %v1500_v11, %v1508_v26 }
 0x182   : > { %v1648_v44 = vadd.f32 %v2079_v52, %v1632_v13  ;;  %v1672_v33 = vadd.f32 %v2722_v58, %v1649_v15  ;;  %v1538_v49 = vmul.f32 %v2416_v5, %v1524_v9  ;;  %v1603_v17 = vadd.f32 %v1516_v59, %v1384_v23 }
 0x184   : > { %v1671_v21 = vadd.f32 %v2722_v58, %v1648_v44  ;;  %1688 = vst.msk [vmem:[%s2737_s30 + $0x58] sm:$0xff] %vm493_vm1, %v1672_v33  ;;  %v1602_v6 = vadd.f32 %v1538_v49, %v1380_v30  ;;  %v1619_v22 = vadd.f32 %v1603_v17, %v1587_v19  ;;  %v1388_v57 = vpop.f32.mrb[68].mxu0 }
 0x185   : > { %v1390_v32 = vpop.f32.mrb[69].mxu0  ;;  %v1501_v29 = vrot.slane %v1388_v57, 7 }
 0x186   : > { %1687 = vst.msk [vmem:[%s2737_s30 + $0x50] sm:$0xff] %vm493_vm1, %v1671_v21  ;;  %v1618_v27 = vadd.f32 %v1602_v6, %v1564_v43  ;;  %v1635_v28 = vadd.f32 %v1619_v22, %v2677_v38  ;;  %v1392_v25 = vpop.f32.mrb[70].mxu0  ;;  %v2081_v38 = vld [vmem:[%s2227_s13 + $0x60] sm:$0xff] }
 0x187   : > { %v1509_v31 = vrot.slane %v1392_v25, 7  ;;  %v1394_v34 = vpop.f32.mrb[71].mxu0 }
 0x188   : > { %v1634_v12 = vadd.f32 %v1618_v27, %v2685_v55  ;;  %v1651_v14 = vadd.f32 %v2080_v37, %v1635_v28 }
 0x189   : > { %v1525_v42 = vsel %vm754_vm3, %v1509_v31, %v1501_v29  ;;  %v1517_v45 = vsel %vm754_vm3, %v1501_v29, %v1509_v31 }
 0x18a   : > { %v1650_v48 = vadd.f32 %v2081_v38, %v1634_v12  ;;  %v1674_v50 = vadd.f32 %v2722_v58, %v1651_v14  ;;  %v1540_v35 = vmul.f32 %v2416_v5, %v1525_v42  ;;  %v1605_v55 = vadd.f32 %v1517_v45, %v1394_v34 }
 0x18c   : > { %v1673_v3 = vadd.f32 %v2722_v58, %v1650_v48  ;;  %1690 = vst.msk [vmem:[%s2737_s30 + $0x68] sm:$0xff] %vm493_vm1, %v1674_v50  ;;  %v1604_v41 = vadd.f32 %v1540_v35, %v1390_v32  ;;  %v1621_v56 = vadd.f32 %v1605_v55, %v1589_v40 }
 0x18e   : > { %1689 = vst.msk [vmem:[%s2737_s30 + $0x60] sm:$0xff] %vm493_vm1, %v1673_v3  ;;  %v1620_v4 = vadd.f32 %v1604_v41, %v1565_v53  ;;  %v1637_v47 = vadd.f32 %v1621_v56, %v2696_v60 }
 0x190   : > { %v1636_v20 = vadd.f32 %v1620_v4, %v2706_v39  ;;  %v1653_v61 = vadd.f32 %v2082_v51, %v1637_v47 }
 0x192   : > { %v1652_v5 = vadd.f32 %v2083_v0, %v1636_v20  ;;  %v1676_v46 = vadd.f32 %v2722_v58, %v1653_v61 }
 0x194   : > { %v1675_v36 = vadd.f32 %v2722_v58, %v1652_v5  ;;  %1692 = vst.msk [vmem:[%s2737_s30 + $0x78] sm:$0xff] %vm493_vm1, %v1676_v46 }
 0x196   : > { %1691 = vst.msk [vmem:[%s2737_s30 + $0x70] sm:$0xff] %vm493_vm1, %v1675_v36 }
 0x197 PF: > { %s15_s22 = sadd.s32 1, %s2122_s22   ;;  %s2889_s18 = smov %s2114_s20 }
 0x198   : > { %p12_p0 = scmp.ge.s32.totalorder %s15_s22, 6   ;;  %s2890_s19 = smov %s2118_s21 }
 0x199   : > { %s2891_s20 = smov %s2894_s23  ;;  %s2892_s21 = smov %s2898_s24 }
 0x19a   :  { %14 = sbr.rel (!%p12_p0) target bundleno = 3 (0x3), region = 78 }

</bundles_post_ra>
